<compile_context>
chip_gen: v7x
topology: tpu7x:2x2x1
jax: 0.10.0
libtpu: 0.0.40
codegen_flags: <defaults>
</compile_context>

<pallas_src>
import jax
import jax.numpy as jnp
import numpy as np
from jax.experimental import pallas as pl
from jax.experimental.pallas import tpu as pltpu


def _gelu_tanh(v):
    # Python-float constants are weak-typed -> computation stays in v.dtype.
    c = 0.7978845608028654  # sqrt(2/pi)
    return 0.5 * v * (1.0 + jnp.tanh(c * (v + 0.044715 * v * v * v)))


def _is_pre_v6_tpu():
    # v5e/v5p/v4/... have no bf16 VPU/EUP -> keep elementwise math in f32 there.
    try:
        kind = jax.devices()[0].device_kind.lower()
    except Exception:
        return True
    return any(t in kind for t in ("v2", "v3", "v4", "v5"))


# ---------------------------------------------------------------------------
# Fused kernel: fc1 + GELU + fc2 on one row-tile.
# ---------------------------------------------------------------------------
def _make_ffn_kernel(gelu_dtype):
    def _ffn_kernel(x_ref, w1_ref, b1_ref, w2_ref, b2_ref, o_ref):
        x = x_ref[...]                                        # (TILE, D) bf16
        h = jnp.dot(x, w1_ref[...],
                    preferred_element_type=jnp.float32) + b1_ref[...]
        g = _gelu_tanh(h.astype(gelu_dtype))                  # bf16 on v6e/v7x
        y = jnp.dot(g.astype(jnp.bfloat16), w2_ref[...],
                    preferred_element_type=jnp.float32) + b2_ref[...]
        o_ref[...] = y.astype(o_ref.dtype)

    return _ffn_kernel


# ---------------------------------------------------------------------------
# Wrapper
# ---------------------------------------------------------------------------
def feed_forward(x, params, *, max_tile_m=512):
    orig_shape = x.shape
    dim = orig_shape[-1]
    hidden = params["w1"].shape[1]

    # Fold batch/seq into one row axis; bf16 cast fused into the same XLA op.
    xm = x.reshape(-1, dim).astype(jnp.bfloat16)
    m = xm.shape[0]

    if m <= max_tile_m:
        tile_m = m                      # single grid step, no padding at all
        m_pad = m
    else:
        tile_m = max_tile_m
        m_pad = pl.cdiv(m, tile_m) * tile_m
        if m_pad != m:
            # Only the ragged tail is padded (zeros flow harmlessly through
            # both matmuls and are sliced off below).
            xm = jnp.pad(xm, ((0, m_pad - m), (0, 0)))
    grid = (m_pad // tile_m,)

    # Weights carried in bf16 by the caller -> these casts are no-ops; f32
    # biases keep the bias add / GELU input accurate.
    w1 = params["w1"].astype(jnp.bfloat16)
    w2 = params["w2"].astype(jnp.bfloat16)
    b1 = params["b1"].reshape(1, hidden).astype(jnp.float32)
    b2 = params["b2"].reshape(1, dim).astype(jnp.float32)

    gelu_dtype = jnp.float32 if _is_pre_v6_tpu() else jnp.bfloat16

    # Explicit VMEM budget: single-buffered resident weights, double-buffered
    # x/out tiles, (tile_m, hidden) intermediate; 2x headroom, 64 MiB cap (v7x).
    weight_bytes = (w1.size + w2.size) * 2 + (b1.size + b2.size) * 4
    io_bytes = 2 * tile_m * dim * 2 + 2 * tile_m * dim * 4
    scratch_bytes = 2 * tile_m * hidden * 4
    vmem_limit = int(min(64 * 1024 * 1024,
                         max(8 * 1024 * 1024,
                             2 * (weight_bytes + io_bytes + scratch_bytes))))

    cost = pl.CostEstimate(
        flops=4 * m_pad * dim * hidden,          # two matmuls
        transcendentals=m_pad * hidden,          # tanh in GELU
        bytes_accessed=m_pad * dim * 2           # x (bf16)
        + m_pad * dim * 4                        # out (f32)
        + weight_bytes,
    )

    resident = pl.Buffered(1)  # constant-block inputs: no second buffer

    out = pl.pallas_call(
        _make_ffn_kernel(gelu_dtype),
        out_shape=jax.ShapeDtypeStruct((m_pad, dim), jnp.float32),
        grid=grid,
        in_specs=[
            pl.BlockSpec((tile_m, dim), lambda i: (i, 0)),            # x tile
            pl.BlockSpec((dim, hidden), lambda i: (0, 0),
                         pipeline_mode=resident),                     # W1
            pl.BlockSpec((1, hidden), lambda i: (0, 0),
                         pipeline_mode=resident),                     # b1
            pl.BlockSpec((hidden, dim), lambda i: (0, 0),
                         pipeline_mode=resident),                     # W2
            pl.BlockSpec((1, dim), lambda i: (0, 0),
                         pipeline_mode=resident),                     # b2
        ],
        out_specs=pl.BlockSpec((tile_m, dim), lambda i: (i, 0)),
        compiler_params=pltpu.CompilerParams(
            dimension_semantics=("parallel",),
            vmem_limit_bytes=vmem_limit),
        cost_estimate=cost,
    )(xm, w1, b1, w2, b2)

    if m_pad != m:
        out = out[:m]
    return out.reshape(orig_shape)


# ---------------------------------------------------------------------------
# Pure-JAX reference (same math, f32 end-to-end) for a correctness check.
# ---------------------------------------------------------------------------
def reference(x, p):
    h = x @ p["w1"] + p["b1"]
    c = 0.7978845608028654
    g = 0.5 * h * (1.0 + jnp.tanh(c * (h + 0.044715 * h ** 3)))
    return g @ p["w2"] + p["b2"]


if __name__ == "__main__":
    B, N, dim, hidden = 2, 256, 128, 256

    key = jax.random.PRNGKey(0)
    kx, k1, k2, k3, k4 = jax.random.split(key, 5)
    x = jax.random.normal(kx, (B, N, dim), jnp.float32)
    params = dict(
        w1=jax.random.normal(k1, (dim, hidden), jnp.float32) * 0.05,
        b1=jax.random.normal(k2, (hidden,), jnp.float32) * 0.02,
        w2=jax.random.normal(k3, (hidden, dim), jnp.float32) * 0.05,
        b2=jax.random.normal(k4, (dim,), jnp.float32) * 0.02,
    )

    # Carry weights in bf16 once (hot-path casts in the wrapper become no-ops).
    params_bf16 = dict(
        w1=params["w1"].astype(jnp.bfloat16),
        b1=params["b1"],
        w2=params["w2"].astype(jnp.bfloat16),
        b2=params["b2"],
    )

    ffn = jax.jit(feed_forward)
    out = jax.block_until_ready(ffn(x, params_bf16))

    ref = reference(x, params)
    np.testing.assert_allclose(np.asarray(out), np.asarray(ref),
                               rtol=2e-2, atol=2e-2)
    print("KERNEL_OK")
</pallas_src>

<mosaic_0001>
module attributes {stable_mosaic.version = 11 : i64} {
  func.func @_ffn_kernel(%arg0: i32, %arg1: memref<512x128xbf16, #tpu.memory_space<vmem>>, %arg2: memref<128x256xbf16, #tpu.memory_space<vmem>>, %arg3: memref<1x256xf32, #tpu.memory_space<vmem>>, %arg4: memref<256x128xbf16, #tpu.memory_space<vmem>>, %arg5: memref<1x128xf32, #tpu.memory_space<vmem>>, %arg6: memref<512x128xf32, #tpu.memory_space<vmem>>) attributes {dimension_semantics = [#tpu.dimension_semantics<parallel>], iteration_bounds = array<i64: 1>, scalar_prefetch = 0 : i64, scratch_operands = 0 : i64, tpu.core_type = #tpu.core_type<tc>, window_params = [{transform_indices = @transform_0, window_bounds = array<i64: 512, 128>}, {pipeline_mode = #tpu.pipeline_mode<synchronous>, transform_indices = @transform_1, window_bounds = array<i64: 128, 256>}, {pipeline_mode = #tpu.pipeline_mode<synchronous>, transform_indices = @transform_2, window_bounds = array<i64: 1, 256>}, {pipeline_mode = #tpu.pipeline_mode<synchronous>, transform_indices = @transform_3, window_bounds = array<i64: 256, 128>}, {pipeline_mode = #tpu.pipeline_mode<synchronous>, transform_indices = @transform_4, window_bounds = array<i64: 1, 128>}, {transform_indices = @transform_5, window_bounds = array<i64: 512, 128>}]} {
    %c0 = arith.constant 0 : index
    %c0_0 = arith.constant 0 : index
    %0 = vector.load %arg1[%c0, %c0_0] : memref<512x128xbf16, #tpu.memory_space<vmem>>, vector<512x128xbf16>
    %c0_1 = arith.constant 0 : index
    %c0_2 = arith.constant 0 : index
    %1 = vector.load %arg2[%c0_1, %c0_2] : memref<128x256xbf16, #tpu.memory_space<vmem>>, vector<128x256xbf16>
    %cst = arith.constant dense<0.000000e+00> : vector<512x256xf32>
    %2 = tpu.matmul %0, %1, %cst {dimension_numbers = #tpu.dot_dimension_numbers<[1], [0], [0], [1], [0, 0, 1, 1], [], []>} : vector<512x128xbf16>, vector<128x256xbf16>, vector<512x256xf32> -> vector<512x256xf32>
    %c0_3 = arith.constant 0 : index
    %c0_4 = arith.constant 0 : index
    %3 = vector.load %arg3[%c0_3, %c0_4] : memref<1x256xf32, #tpu.memory_space<vmem>>, vector<1x256xf32>
    %4 = vector.broadcast %3 : vector<1x256xf32> to vector<512x256xf32>
    %5 = arith.addf %2, %4 : vector<512x256xf32>
    %6 = arith.truncf %5 : vector<512x256xf32> to vector<512x256xbf16>
    %cst_5 = arith.constant 5.000000e-01 : bf16
    %7 = vector.broadcast %cst_5 : bf16 to vector<512x256xbf16>
    %8 = arith.mulf %7, %6 : vector<512x256xbf16>
    %cst_6 = arith.constant 4.467770e-02 : bf16
    %9 = vector.broadcast %cst_6 : bf16 to vector<512x256xbf16>
    %10 = arith.mulf %9, %6 : vector<512x256xbf16>
    %11 = arith.mulf %10, %6 : vector<512x256xbf16>
    %12 = arith.mulf %11, %6 : vector<512x256xbf16>
    %13 = arith.addf %6, %12 : vector<512x256xbf16>
    %cst_7 = arith.constant 7.968750e-01 : bf16
    %14 = vector.broadcast %cst_7 : bf16 to vector<512x256xbf16>
    %15 = arith.mulf %14, %13 : vector<512x256xbf16>
    %16 = math.tanh %15 : vector<512x256xbf16>
    %cst_8 = arith.constant 1.000000e+00 : bf16
    %17 = vector.broadcast %cst_8 : bf16 to vector<512x256xbf16>
    %18 = arith.addf %17, %16 : vector<512x256xbf16>
    %19 = arith.mulf %8, %18 : vector<512x256xbf16>
    %c0_9 = arith.constant 0 : index
    %c0_10 = arith.constant 0 : index
    %20 = vector.load %arg4[%c0_9, %c0_10] : memref<256x128xbf16, #tpu.memory_space<vmem>>, vector<256x128xbf16>
    %cst_11 = arith.constant dense<0.000000e+00> : vector<512x128xf32>
    %21 = tpu.matmul %19, %20, %cst_11 {dimension_numbers = #tpu.dot_dimension_numbers<[1], [0], [0], [1], [0, 0, 1, 1], [], []>} : vector<512x256xbf16>, vector<256x128xbf16>, vector<512x128xf32> -> vector<512x128xf32>
    %c0_12 = arith.constant 0 : index
    %c0_13 = arith.constant 0 : index
    %22 = vector.load %arg5[%c0_12, %c0_13] : memref<1x128xf32, #tpu.memory_space<vmem>>, vector<1x128xf32>
    %23 = vector.broadcast %22 : vector<1x128xf32> to vector<512x128xf32>
    %24 = arith.addf %21, %23 : vector<512x128xf32>
    %c0_14 = arith.constant 0 : index
    %c0_15 = arith.constant 0 : index
    %25 = vector.load %arg6[%c0_14, %c0_15] : memref<512x128xf32, #tpu.memory_space<vmem>>, vector<512x128xf32>
    tpu.vector_store %arg6[%c0_14, %c0_15], %24 {strides = array<i32>} : memref<512x128xf32, #tpu.memory_space<vmem>>, vector<512x128xf32>,
    return
  }
  func.func @transform_0(%arg0: i32) -> (i32, i32) {
    %c0_i32 = arith.constant 0 : i32
    %c0_i32_0 = arith.constant 0 : i32
    return %arg0, %c0_i32 : i32, i32
  }
  func.func @transform_1(%arg0: i32) -> (i32, i32) {
    %c0_i32 = arith.constant 0 : i32
    %c0_i32_0 = arith.constant 0 : i32
    %c0_i32_1 = arith.constant 0 : i32
    return %c0_i32, %c0_i32_0 : i32, i32
  }
  func.func @transform_2(%arg0: i32) -> (i32, i32) {
    %c0_i32 = arith.constant 0 : i32
    %c0_i32_0 = arith.constant 0 : i32
    %c0_i32_1 = arith.constant 0 : i32
    return %c0_i32, %c0_i32_0 : i32, i32
  }
  func.func @transform_3(%arg0: i32) -> (i32, i32) {
    %c0_i32 = arith.constant 0 : i32
    %c0_i32_0 = arith.constant 0 : i32
    %c0_i32_1 = arith.constant 0 : i32
    return %c0_i32, %c0_i32_0 : i32, i32
  }
  func.func @transform_4(%arg0: i32) -> (i32, i32) {
    %c0_i32 = arith.constant 0 : i32
    %c0_i32_0 = arith.constant 0 : i32
    %c0_i32_1 = arith.constant 0 : i32
    return %c0_i32, %c0_i32_0 : i32, i32
  }
  func.func @transform_5(%arg0: i32) -> (i32, i32) {
    %c0_i32 = arith.constant 0 : i32
    %c0_i32_0 = arith.constant 0 : i32
    return %arg0, %c0_i32 : i32, i32
  }
}

</mosaic_0001>

<bundles_post_ra>
// kernel: feed_forward.1
= control target key start
LH: loop header
LB: loop body
LE: loop exit
PB: predicated region body
PF: predicated region fallthrough
CT: control target
= control target key end

     0   :  { %v2212_v2 = vmov 0   ;;  %s3166_s0 = inlined_call_operand.vmem [shape: bf16[512,128], index: 0, kind: input, shape index: {}]   ;;  %s3167_s1 = inlined_call_operand.vmem [shape: bf16[128,256], index: 1, kind: input, shape index: {}]   ;;  %s3168_s2 = inlined_call_operand.vmem [shape: f32[1,256], index: 2, kind: input, shape index: {}]   ;;  %s3169_s3 = inlined_call_operand.vmem [shape: bf16[256,128], index: 3, kind: input, shape index: {}]   ;;  %s3170_s4 = inlined_call_operand.vmem [shape: f32[1,128], index: 4, kind: input, shape index: {}]   ;;  %s3171_s5 = inlined_call_operand.hbm [shape: f32[512,128], index: 5, kind: output, shape index: {}]  }
   0x1   :  { %v1988_v0 = vld [vmem:[%s3167_s1 + $0x4] ss:$8 sps:$4 sm:$0xff]   ;;  %v1990_v1 = vld [vmem:[%s3167_s1] ss:$8 sps:$4 sm:$0xff]   ;;  %422 = vmatprep.mubr.bf16.mxu0 %v2212_v2  ;;  %1952 = vmatprep.subr.bf16.mxu1 %v2212_v2  ;;  %v1991_v3 = vld [vmem:[%s3167_s1 + $0x14] ss:$8 sps:$4 sm:$0xff]  }
   0x2   :  { %390 = vmatprep.subr.bf16.mxu0 %v1988_v0  ;;  %v1993_v4 = vld [vmem:[%s3167_s1 + $0x10] ss:$8 sps:$4 sm:$0xff]   ;;  %v1994_v5 = vld [vmem:[%s3167_s1 + $0x24] ss:$8 sps:$4 sm:$0xff]   ;;  %v1996_v6 = vld [vmem:[%s3167_s1 + $0x20] ss:$8 sps:$4 sm:$0xff]  }
   0x3   :  { %391 = vmatpush1.bf16.msra.mxu0 %v1990_v1  ;;  %v1997_v7 = vld [vmem:[%s3167_s1 + $0x34] ss:$8 sps:$4 sm:$0xff]   ;;  %v1999_v8 = vld [vmem:[%s3167_s1 + $0x30] ss:$8 sps:$4 sm:$0xff]   ;;  %v2000_v9 = vld [vmem:[%s3167_s1 + $0x44] ss:$8 sps:$4 sm:$0xff]  }
   0x4   :  { %392 = vmatprep.subr.bf16.mxu0 %v1991_v3  ;;  %v2002_v10 = vld [vmem:[%s3167_s1 + $0x40] ss:$8 sps:$4 sm:$0xff]   ;;  %v2003_v11 = vld [vmem:[%s3167_s1 + $0x54] ss:$8 sps:$4 sm:$0xff]   ;;  %v2005_v12 = vld [vmem:[%s3167_s1 + $0x50] ss:$8 sps:$4 sm:$0xff]  }
   0x5   :  { %v2006_v13 = vld [vmem:[%s3167_s1 + $0x64] ss:$8 sps:$4 sm:$0xff]   ;;  %v2008_v14 = vld [vmem:[%s3167_s1 + $0x60] ss:$8 sps:$4 sm:$0xff]   ;;  %v2009_v15 = vld [vmem:[%s3167_s1 + $0x74] ss:$8 sps:$4 sm:$0xff]  }
   0x6   :  { %v2011_v16 = vld [vmem:[%s3167_s1 + $0x70] ss:$8 sps:$4 sm:$0xff]   ;;  %v2012_v17 = vld [vmem:[%s3166_s0] sm:$0xff]   ;;  %v2013_v18 = vld [vmem:[%s3166_s0 + $0x8] sm:$0xff]  }
   0x7   :  { %393 = vmatpush1.bf16.msra.mxu0 %v1993_v4  ;;  %v2014_v19 = vld [vmem:[%s3166_s0 + $0x10] sm:$0xff]  }
   0x8   :  { %394 = vmatprep.subr.bf16.mxu0 %v1994_v5 }
   0xb   :  { %395 = vmatpush1.bf16.msra.mxu0 %v1996_v6 }
   0xc   :  { %396 = vmatprep.subr.bf16.mxu0 %v1997_v7 }
   0xf   :  { %397 = vmatpush1.bf16.msra.mxu0 %v1999_v8 }
  0x10   :  { %398 = vmatprep.subr.bf16.mxu0 %v2000_v9 }
  0x13   :  { %399 = vmatpush1.bf16.msra.mxu0 %v2002_v10 }
  0x14   :  { %400 = vmatprep.subr.bf16.mxu0 %v2003_v11 }
  0x17   :  { %401 = vmatpush1.bf16.msra.mxu0 %v2005_v12 }
  0x18   :  { %402 = vmatprep.subr.bf16.mxu0 %v2006_v13 }
  0x1b   :  { %403 = vmatpush1.bf16.msra.mxu0 %v2008_v14 }
  0x1c   :  { %404 = vmatprep.subr.bf16.mxu0 %v2009_v15 }
  0x1f   :  { %405 = vmatpush1.bf16.msra.mxu0 %v2011_v16 }
  0x20   :  { %1518 = vmatprep.subr.bf16.mxu0 %v2212_v2 }
  0x22   :  { %423 = vmatmul.mubr.bf16.vlgmr.msra.gmra.mrb[0].mxu0 %v2012_v17 }
  0x23   :  { %432 = vmatprep.mubr.bf16.mxu0 %v2212_v2 }
  0x2a   :  { %433 = vmatmul.mubr.bf16.gmra.mrb[4].mxu0 %v2013_v18 }
  0x2b   :  { %442 = vmatprep.mubr.bf16.mxu0 %v2212_v2 }
  0x2c   :  { %10 = vsyncpa [#allocation3], 0  ;;  %v2015_v20 = vld [vmem:[%s3166_s0 + $0x18] sm:$0xff]   ;;  %v2016_v21 = vld [vmem:[%s3166_s0 + $0x20] sm:$0xff]   ;;  %v108_v59 = vlaneseq }
  0x2d   :  { %v2017_v22 = vld [vmem:[%s3166_s0 + $0x28] sm:$0xff]   ;;  %v2018_v23 = vld [vmem:[%s3166_s0 + $0x30] sm:$0xff]   ;;  %v2019_v24 = vld [vmem:[%s3166_s0 + $0x38] sm:$0xff]  }
  0x2e   :  { %v2020_v25 = vld [vmem:[%s3166_s0 + $0x40] sm:$0xff]   ;;  %v2038_v27 = vld [vmem:[%s3169_s3 + $0x8] sm:$0xff]   ;;  %v2040_v29 = vld [vmem:[%s3169_s3 + $0x10] sm:$0xff]   ;;  %v109_v60 = vshrl.u32 %v108_v59, 7 }
  0x2f   :  { %v2037_v26 = vld [vmem:[%s3169_s3] sm:$0xff]   ;;  %v2021_v28 = vld [vmem:[%s3166_s0 + $0x48] sm:$0xff]   ;;  %v2041_v30 = vld [vmem:[%s3169_s3 + $0x18] sm:$0xff]  }
  0x30   :  { %1519 = vmatpush1.bf16.msra.mxu0 %v2037_v26  ;;  %1968 = vmatpush1.bf16.msra.mxu1 %v2037_v26  ;;  %v2022_v31 = vld [vmem:[%s3166_s0 + $0x50] sm:$0xff]   ;;  %v2043_v32 = vld [vmem:[%s3169_s3 + $0x20] sm:$0xff]   ;;  %v2044_v33 = vld [vmem:[%s3169_s3 + $0x28] sm:$0xff]   ;;  %v110_v62 = vsub.s32 0, %v109_v60  ;;  %v114_v0 = vsub.s32 1, %v109_v60 }
  0x31   :  { %1520 = vmatprep.subr.bf16.mxu0 %v2212_v2  ;;  %1953 = vmatprep.subr.bf16.mxu1 %v2212_v2  ;;  %v2023_v34 = vld [vmem:[%s3166_s0 + $0x58] sm:$0xff]   ;;  %v2046_v35 = vld [vmem:[%s3169_s3 + $0x30] sm:$0xff]   ;;  %v2024_v37 = vld [vmem:[%s3166_s0 + $0x60] sm:$0xff]  }
  0x32   :  { %443 = vmatmul.mubr.bf16.gmra.mrb[8].mxu0 %v2014_v19  ;;  %v2047_v36 = vld [vmem:[%s3169_s3 + $0x38] sm:$0xff]   ;;  %v2049_v38 = vld [vmem:[%s3169_s3 + $0x40] sm:$0xff]   ;;  %v2050_v39 = vld [vmem:[%s3169_s3 + $0x48] sm:$0xff]  }
  0x33   :  { %452 = vmatprep.mubr.bf16.mxu0 %v2212_v2  ;;  %v2025_v40 = vld [vmem:[%s3166_s0 + $0x68] sm:$0xff]   ;;  %v2052_v41 = vld [vmem:[%s3169_s3 + $0x50] sm:$0xff]   ;;  %v2053_v42 = vld [vmem:[%s3169_s3 + $0x58] sm:$0xff]  }
  0x34   :  { %1521 = vmatpush1.bf16.msra.mxu0 %v2038_v27  ;;  %1969 = vmatpush1.bf16.msra.mxu1 %v2038_v27  ;;  %v2026_v43 = vld [vmem:[%s3166_s0 + $0x70] sm:$0xff]   ;;  %v2055_v44 = vld [vmem:[%s3169_s3 + $0x60] sm:$0xff]   ;;  %v2056_v45 = vld [vmem:[%s3169_s3 + $0x68] sm:$0xff]  }
  0x35   :  { %1522 = vmatprep.subr.bf16.mxu0 %v2212_v2  ;;  %1954 = vmatprep.subr.bf16.mxu1 %v2212_v2  ;;  %v2027_v46 = vld [vmem:[%s3166_s0 + $0x78] sm:$0xff]   ;;  %v2058_v47 = vld [vmem:[%s3169_s3 + $0x70] sm:$0xff]   ;;  %v2028_v49 = vld [vmem:[%s3166_s0 + $0x80] sm:$0xff]  }
  0x36   :  { %v2059_v48 = vld [vmem:[%s3169_s3 + $0x78] sm:$0xff]   ;;  %v2029_v50 = vld [vmem:[%s3166_s0 + $0x88] sm:$0xff]   ;;  %v2030_v51 = vld [vmem:[%s3166_s0 + $0x90] sm:$0xff]  }
  0x37   :  { %v2031_v52 = vld [vmem:[%s3166_s0 + $0x98] sm:$0xff]   ;;  %v2032_v53 = vld [vmem:[%s3166_s0 + $0xa0] sm:$0xff]   ;;  %v2033_v54 = vld [vmem:[%s3166_s0 + $0xa8] sm:$0xff]  }
  0x38   :  { %1523 = vmatpush1.bf16.msra.mxu0 %v2040_v29  ;;  %1970 = vmatpush1.bf16.msra.mxu1 %v2040_v29  ;;  %v2034_v55 = vld [vmem:[%s3166_s0 + $0xb0] sm:$0xff]   ;;  %v2035_v56 = vld [vmem:[%s3166_s0 + $0xb8] sm:$0xff]   ;;  %v2036_v57 = vld [vmem:[%s3166_s0 + $0xc0] sm:$0xff]  }
  0x39   :  { %1524 = vmatprep.subr.bf16.mxu0 %v2212_v2  ;;  %1955 = vmatprep.subr.bf16.mxu1 %v2212_v2  ;;  %v2039_v58 = vld [vmem:[%s3166_s0 + $0xc8] sm:$0xff]   ;;  %v2042_v61 = vld [vmem:[%s3166_s0 + $0xd0] sm:$0xff]   ;;  %v106_v63 = vld [vmem:[%s3168_s2] sm:$0x3] }
  0x3a   :  { %453 = vmatmul.mubr.bf16.gmra.mrb[12].mxu0 %v2015_v20  ;;  %v2486_v1 = vrot.slane %v106_v63, %v110_v62  ;;  %v2488_v4 = vrot.slane %v106_v63, %v114_v0  ;;  %v2045_v6 = vld [vmem:[%s3166_s0 + $0xd8] sm:$0xff]   ;;  %v2048_v20 = vld [vmem:[%s3166_s0 + $0xe0] sm:$0xff]   ;;  %v2054_v59 = vld [vmem:[%s3166_s0 + $0xf0] sm:$0xff]  }
  0x3b   :  { %462 = vmatprep.mubr.bf16.mxu0 %v2212_v2 }
  0x3c   :  { %1525 = vmatpush1.bf16.msra.mxu0 %v2041_v30  ;;  %1971 = vmatpush1.bf16.msra.mxu1 %v2041_v30 }
  0x3d   :  { %1526 = vmatprep.subr.bf16.mxu0 %v2212_v2  ;;  %1956 = vmatprep.subr.bf16.mxu1 %v2212_v2 }
  0x40   :  { %1527 = vmatpush1.bf16.msra.mxu0 %v2043_v32  ;;  %1972 = vmatpush1.bf16.msra.mxu1 %v2043_v32 }
  0x41   :  { %1528 = vmatprep.subr.bf16.mxu0 %v2212_v2  ;;  %1957 = vmatprep.subr.bf16.mxu1 %v2212_v2 }
  0x42   :  { %463 = vmatmul.mubr.bf16.gmra.mrb[16].mxu0 %v2016_v21 }
  0x43   :  { %472 = vmatprep.mubr.bf16.mxu0 %v2212_v2 }
  0x44   :  { %1529 = vmatpush1.bf16.msra.mxu0 %v2044_v33  ;;  %1973 = vmatpush1.bf16.msra.mxu1 %v2044_v33 }
  0x45   :  { %1530 = vmatprep.subr.bf16.mxu0 %v2212_v2  ;;  %1958 = vmatprep.subr.bf16.mxu1 %v2212_v2 }
  0x48   :  { %1531 = vmatpush1.bf16.msra.mxu0 %v2046_v35  ;;  %1974 = vmatpush1.bf16.msra.mxu1 %v2046_v35 }
  0x49   :  { %1532 = vmatprep.subr.bf16.mxu0 %v2212_v2  ;;  %1959 = vmatprep.subr.bf16.mxu1 %v2212_v2 }
  0x4a   :  { %473 = vmatmul.mubr.bf16.gmra.mrb[20].mxu0 %v2017_v22 }
  0x4b   :  { %482 = vmatprep.mubr.bf16.mxu0 %v2212_v2 }
  0x4c   :  { %1533 = vmatpush1.bf16.msra.mxu0 %v2047_v36  ;;  %1975 = vmatpush1.bf16.msra.mxu1 %v2047_v36 }
  0x4d   :  { %1534 = vmatprep.subr.bf16.mxu0 %v2212_v2  ;;  %1960 = vmatprep.subr.bf16.mxu1 %v2212_v2 }
  0x50   :  { %1535 = vmatpush1.bf16.msra.mxu0 %v2049_v38  ;;  %1976 = vmatpush1.bf16.msra.mxu1 %v2049_v38 }
  0x51   :  { %1536 = vmatprep.subr.bf16.mxu0 %v2212_v2  ;;  %1961 = vmatprep.subr.bf16.mxu1 %v2212_v2 }
  0x52   :  { %483 = vmatmul.mubr.bf16.gmra.mrb[24].mxu0 %v2018_v23 }
  0x53   :  { %492 = vmatprep.mubr.bf16.mxu0 %v2212_v2 }
  0x54   :  { %1537 = vmatpush1.bf16.msra.mxu0 %v2050_v39  ;;  %1977 = vmatpush1.bf16.msra.mxu1 %v2050_v39  ;;  %v2051_v39 = vld [vmem:[%s3166_s0 + $0xe8] sm:$0xff]  }
  0x55   :  { %1538 = vmatprep.subr.bf16.mxu0 %v2212_v2  ;;  %1962 = vmatprep.subr.bf16.mxu1 %v2212_v2 }
  0x58   :  { %1539 = vmatpush1.bf16.msra.mxu0 %v2052_v41  ;;  %1978 = vmatpush1.bf16.msra.mxu1 %v2052_v41 }
  0x59   :  { %1540 = vmatprep.subr.bf16.mxu0 %v2212_v2  ;;  %1963 = vmatprep.subr.bf16.mxu1 %v2212_v2 }
  0x5a   :  { %493 = vmatmul.mubr.bf16.gmra.mrb[28].mxu0 %v2019_v24 }
  0x5b   :  { %502 = vmatprep.mubr.bf16.mxu0 %v2212_v2 }
  0x5c   :  { %1541 = vmatpush1.bf16.msra.mxu0 %v2053_v42  ;;  %1979 = vmatpush1.bf16.msra.mxu1 %v2053_v42 }
  0x5d   :  { %1542 = vmatprep.subr.bf16.mxu0 %v2212_v2  ;;  %1964 = vmatprep.subr.bf16.mxu1 %v2212_v2 }
  0x60   :  { %1543 = vmatpush1.bf16.msra.mxu0 %v2055_v44  ;;  %1980 = vmatpush1.bf16.msra.mxu1 %v2055_v44 }
  0x61   :  { %1544 = vmatprep.subr.bf16.mxu0 %v2212_v2  ;;  %1965 = vmatprep.subr.bf16.mxu1 %v2212_v2 }
  0x62   :  { %503 = vmatmul.mubr.bf16.gmra.mrb[32].mxu0 %v2020_v25 }
  0x63   :  { %512 = vmatprep.mubr.bf16.mxu0 %v2212_v2 }
  0x64   :  { %1545 = vmatpush1.bf16.msra.mxu0 %v2056_v45  ;;  %1981 = vmatpush1.bf16.msra.mxu1 %v2056_v45 }
  0x65   :  { %1546 = vmatprep.subr.bf16.mxu0 %v2212_v2  ;;  %1966 = vmatprep.subr.bf16.mxu1 %v2212_v2 }
  0x68   :  { %1547 = vmatpush1.bf16.msra.mxu0 %v2058_v47  ;;  %1982 = vmatpush1.bf16.msra.mxu1 %v2058_v47 }
  0x69   :  { %1548 = vmatprep.subr.bf16.mxu0 %v2212_v2  ;;  %1967 = vmatprep.subr.bf16.mxu1 %v2212_v2 }
  0x6a   :  { %513 = vmatmul.mubr.bf16.gmra.mrb[36].mxu0 %v2021_v28 }
  0x6b   :  { %522 = vmatprep.mubr.bf16.mxu0 %v2212_v2 }
  0x6c   :  { %1549 = vmatpush1.bf16.msra.mxu0 %v2059_v48  ;;  %1983 = vmatpush1.bf16.msra.mxu1 %v2059_v48 }
  0x72   :  { %523 = vmatmul.mubr.bf16.gmra.mrb[40].mxu0 %v2022_v31 }
  0x73   :  { %532 = vmatprep.mubr.bf16.mxu0 %v2212_v2 }
  0x7a   :  { %533 = vmatmul.mubr.bf16.gmra.mrb[44].mxu0 %v2023_v34 }
  0x7b   :  { %542 = vmatprep.mubr.bf16.mxu0 %v2212_v2 }
  0x82   :  { %543 = vmatmul.mubr.bf16.gmra.mrb[48].mxu0 %v2024_v37 }
  0x83   :  { %552 = vmatprep.mubr.bf16.mxu0 %v2212_v2 }
  0x8a   :  { %553 = vmatmul.mubr.bf16.gmra.mrb[52].mxu0 %v2025_v40 }
  0x8b   :  { %562 = vmatprep.mubr.bf16.mxu0 %v2212_v2 }
  0x92   :  { %563 = vmatmul.mubr.bf16.gmra.mrb[56].mxu0 %v2026_v43 }
  0x93   :  { %572 = vmatprep.mubr.bf16.mxu0 %v2212_v2 }
  0x9a   :  { %573 = vmatmul.mubr.bf16.gmra.mrb[60].mxu0 %v2027_v46 }
  0x9b   :  { %582 = vmatprep.mubr.bf16.mxu0 %v2212_v2 }
  0xa2   :  { %583 = vmatmul.mubr.bf16.gmra.mrb[64].mxu0 %v2028_v49 }
  0xa3   :  { %592 = vmatprep.mubr.bf16.mxu0 %v2212_v2 }
  0xaa   :  { %593 = vmatmul.mubr.bf16.gmra.mrb[68].mxu0 %v2029_v50 }
  0xab   :  { %602 = vmatprep.mubr.bf16.mxu0 %v2212_v2 }
  0xb2   :  { %603 = vmatmul.mubr.bf16.gmra.mrb[72].mxu0 %v2030_v51 }
  0xb3   :  { %612 = vmatprep.mubr.bf16.mxu0 %v2212_v2 }
  0xba   :  { %613 = vmatmul.mubr.bf16.gmra.mrb[76].mxu0 %v2031_v52 }
  0xbb   :  { %622 = vmatprep.mubr.bf16.mxu0 %v2212_v2 }
  0xc2   :  { %623 = vmatmul.mubr.bf16.gmra.mrb[80].mxu0 %v2032_v53 }
  0xc3   :  { %632 = vmatprep.mubr.bf16.mxu0 %v2212_v2 }
  0xca   :  { %633 = vmatmul.mubr.bf16.gmra.mrb[84].mxu0 %v2033_v54 }
  0xcb   :  { %642 = vmatprep.mubr.bf16.mxu0 %v2212_v2 }
  0xd2   :  { %643 = vmatmul.mubr.bf16.gmra.mrb[88].mxu0 %v2034_v55 }
  0xd3   :  { %652 = vmatprep.mubr.bf16.mxu0 %v2212_v2 }
  0xda   :  { %653 = vmatmul.mubr.bf16.gmra.mrb[92].mxu0 %v2035_v56 }
  0xdb   :  { %662 = vmatprep.mubr.bf16.mxu0 %v2212_v2 }
  0xe2   :  { %663 = vmatmul.mubr.bf16.gmra.mrb[96].mxu0 %v2036_v57 }
  0xe3   :  { %672 = vmatprep.mubr.bf16.mxu0 %v2212_v2 }
  0xea   :  { %673 = vmatmul.mubr.bf16.gmra.mrb[100].mxu0 %v2039_v58 }
  0xeb   :  { %682 = vmatprep.mubr.bf16.mxu0 %v2212_v2 }
  0xf2   :  { %683 = vmatmul.mubr.bf16.gmra.mrb[104].mxu0 %v2042_v61 }
  0xf3   :  { %692 = vmatprep.mubr.bf16.mxu0 %v2212_v2 }
  0xf5   :  { %v424_v3 = vpop.f32.mrb[0].mxu0 }
  0xf6   :  { %v426_v5 = vpop.f32.mrb[1].mxu0  ;;  %v425_v8 = vadd.f32 %v424_v3, %v2486_v1 }
  0xf7   :  { %v428_v7 = vpop.f32.mrb[2].mxu0  ;;  %v427_v11 = vadd.f32 %v426_v5, %v2488_v4 }
  0xf8   :  { %v429_v9 = vadd.f32 %v428_v7, %v2486_v1  ;;  %v430_v10 = vpop.f32.mrb[3].mxu0 }
  0xf9   :  { %v431_v12 = vadd.f32 %v430_v10, %v2488_v4 }
  0xfa   :  { %v2497_v13 = vpack.c.bf16 %v429_v9, %v425_v8  ;;  %693 = vmatmul.mubr.bf16.gmra.mrb[108].mxu0 %v2045_v6 }
  0xfb   :  { %v2499_v14 = vpack.c.bf16 %v431_v12, %v427_v11  ;;  %702 = vmatprep.mubr.bf16.mxu0 %v2212_v2 }
  0xfc   :  { %v871_v15 = vmul.bf16 1027030327, %v2497_v13 }
  0xfd   :  { %v872_v16 = vmul.bf16 1027030327, %v2499_v14  ;;  %v434_v17 = vpop.f32.mrb[4].mxu0 }
  0xfe   :  { %v935_v18 = vmul.bf16 %v871_v15, %v2497_v13  ;;  %v436_v19 = vpop.f32.mrb[5].mxu0  ;;  %v435_v24 = vadd.f32 %v434_v17, %v2486_v1 }
  0xff   :  { %v438_v21 = vpop.f32.mrb[6].mxu0  ;;  %v936_v22 = vmul.bf16 %v872_v16, %v2499_v14  ;;  %v437_v27 = vadd.f32 %v436_v19, %v2488_v4 }
 0x100   :  { %v999_v23 = vmul.bf16 %v935_v18, %v2497_v13  ;;  %v439_v25 = vadd.f32 %v438_v21, %v2486_v1  ;;  %v440_v26 = vpop.f32.mrb[7].mxu0 }
 0x101   :  { %v441_v28 = vadd.f32 %v440_v26, %v2488_v4  ;;  %v1000_v29 = vmul.bf16 %v936_v22, %v2499_v14 }
 0x102   :  { %v2515_v30 = vpack.c.bf16 %v439_v25, %v435_v24  ;;  %703 = vmatmul.mubr.bf16.gmra.mrb[112].mxu0 %v2048_v20  ;;  %v1063_v33 = vadd.bf16 %v999_v23, %v2497_v13  ;;  %v2057_v24 = vld [vmem:[%s3166_s0 + $0xf8] sm:$0xff]   ;;  %v808_v25 = vmul.bf16 1056980736, %v2499_v14 }
 0x103   :  { %v2517_v31 = vpack.c.bf16 %v441_v28, %v437_v27  ;;  %712 = vmatprep.mubr.bf16.mxu0 %v2212_v2  ;;  %v1064_v32 = vadd.bf16 %v1000_v29, %v2499_v14 }
 0x104   :  { %v873_v34 = vmul.bf16 1027030327, %v2515_v30  ;;  %v1127_v43 = vmul.bf16 1061961548, %v1063_v33 }
 0x105   :  { %v874_v35 = vmul.bf16 1027030327, %v2517_v31  ;;  %v444_v36 = vpop.f32.mrb[8].mxu0  ;;  %v1128_v37 = vmul.bf16 1061961548, %v1064_v32 }
 0x106   :  { %v446_v38 = vpop.f32.mrb[9].mxu0  ;;  %v937_v40 = vmul.bf16 %v873_v34, %v2515_v30  ;;  %v445_v44 = vadd.f32 %v444_v36, %v2486_v1 }
 0x107   :  { %v448_v41 = vpop.f32.mrb[10].mxu0  ;;  %2060 = vtanh.bf16 %v1128_v37  ;;  %v938_v42 = vmul.bf16 %v874_v35, %v2517_v31  ;;  %v447_v47 = vadd.f32 %v446_v38, %v2488_v4 }
 0x108   :  { %v449_v45 = vadd.f32 %v448_v41, %v2486_v1  ;;  %v450_v46 = vpop.f32.mrb[11].mxu0  ;;  %v1001_v50 = vmul.bf16 %v937_v40, %v2515_v30  ;;  %2062 = vtanh.bf16 %v1127_v43 }
 0x109   :  { %v451_v48 = vadd.f32 %v450_v46, %v2488_v4  ;;  %v1002_v49 = vmul.bf16 %v938_v42, %v2517_v31  ;;  %v807_v46 = vmul.bf16 1056980736, %v2497_v13 }
 0x10a   :  { %v2535_v51 = vpack.c.bf16 %v449_v45, %v445_v44  ;;  %713 = vmatmul.mubr.bf16.gmra.mrb[116].mxu0 %v2051_v39  ;;  %v1065_v57 = vadd.bf16 %v1001_v50, %v2515_v30 }
 0x10b   :  { %v2537_v52 = vpack.c.bf16 %v451_v48, %v447_v47  ;;  %722 = vmatprep.mubr.bf16.mxu0 %v2212_v2  ;;  %v1066_v53 = vadd.bf16 %v1002_v49, %v2517_v31 }
 0x10c   :  { %v875_v54 = vmul.bf16 1027030327, %v2535_v51  ;;  %v1129_v9 = vmul.bf16 1061961548, %v1065_v57 }
 0x10d   :  { %v454_v55 = vpop.f32.mrb[12].mxu0  ;;  %v1130_v56 = vmul.bf16 1061961548, %v1066_v53  ;;  %v876_v60 = vmul.bf16 1027030327, %v2537_v52 }
 0x10e   :  { %v456_v58 = vpop.f32.mrb[13].mxu0  ;;  %v939_v61 = vmul.bf16 %v875_v54, %v2535_v51  ;;  %v455_v63 = vadd.f32 %v454_v55, %v2486_v1 }
 0x10f   :  { %v458_v62 = vpop.f32.mrb[14].mxu0  ;;  %2064 = vtanh.bf16 %v1130_v56  ;;  %v940_v5 = vmul.bf16 %v876_v60, %v2537_v52  ;;  %v457_v7 = vadd.f32 %v456_v58, %v2488_v4  ;;  %v810_v58 = vmul.bf16 1056980736, %v2517_v31 }
 0x110   :  { %v459_v0 = vadd.f32 %v458_v62, %v2486_v1  ;;  %v460_v3 = vpop.f32.mrb[15].mxu0  ;;  %v1003_v6 = vmul.bf16 %v939_v61, %v2535_v51  ;;  %2066 = vtanh.bf16 %v1129_v9  ;;  %v811_v9 = vmul.bf16 1056980736, %v2535_v51 }
 0x111   :  { %v461_v8 = vadd.f32 %v460_v3, %v2488_v4  ;;  %v1004_v12 = vmul.bf16 %v940_v5, %v2537_v52 }
 0x112   :  { %v2061_v10 = vpop.eup %2060  ;;  %v2554_v11 = vpack.c.bf16 %v459_v0, %v455_v63  ;;  %723 = vmatmul.mubr.bf16.gmra.mrb[120].mxu0 %v2054_v59  ;;  %v1067_v15 = vadd.bf16 %v1003_v6, %v2535_v51 }
 0x113   :  { %v2558_v16 = vpack.c.bf16 %v461_v8, %v457_v7  ;;  %732 = vmatprep.mubr.bf16.mxu0 %v2212_v2  ;;  %v1256_v18 = vadd.bf16 1065369472, %v2061_v10  ;;  %v1068_v19 = vadd.bf16 %v1004_v12, %v2537_v52  ;;  %v2063_v29 = vpop.eup %2062  ;;  %v812_v8 = vmul.bf16 1056980736, %v2537_v52 }
 0x114   :  { %v877_v17 = vmul.bf16 1027030327, %v2554_v11  ;;  %v1131_v20 = vmul.bf16 1061961548, %v1067_v15  ;;  %v1255_v42 = vadd.bf16 1065369472, %v2063_v29 }
 0x115   :  { %v878_v21 = vmul.bf16 1027030327, %v2558_v16  ;;  %v464_v22 = vpop.f32.mrb[16].mxu0  ;;  %v1132_v26 = vmul.bf16 1061961548, %v1068_v19  ;;  %v1320_v35 = vmul.bf16 %v1256_v18, %v808_v25 }
 0x116   :  { %v466_v23 = vpop.f32.mrb[17].mxu0  ;;  %2068 = vtanh.bf16 %v1131_v20  ;;  %v941_v28 = vmul.bf16 %v877_v17, %v2554_v11  ;;  %v465_v32 = vadd.f32 %v464_v22, %v2486_v1  ;;  %v1319_v57 = vmul.bf16 %v1255_v42, %v807_v46 }
 0x117   :  { %v468_v2 = vpop.f32.mrb[18].mxu0  ;;  %v942_v27 = vmul.bf16 %v878_v21, %v2558_v16  ;;  %2070 = vtanh.bf16 %v1132_v26  ;;  %v467_v36 = vadd.f32 %v466_v23, %v2488_v4  ;;  %v809_v26 = vmul.bf16 1056980736, %v2515_v30 }
 0x118   :  { %v469_v33 = vadd.f32 %v468_v2, %v2486_v1  ;;  %v470_v34 = vpop.f32.mrb[19].mxu0  ;;  %v1005_v38 = vmul.bf16 %v941_v28, %v2554_v11 }
 0x119   :  { %v471_v37 = vadd.f32 %v470_v34, %v2488_v4  ;;  %v1006_v14 = vmul.bf16 %v942_v27, %v2558_v16 }
 0x11a   :  { %v2065_v39 = vpop.eup %2064  ;;  %v2576_v40 = vpack.c.bf16 %v469_v33, %v465_v32  ;;  %733 = vmatmul.mubr.bf16.gmra.mrb[124].mxu0 %v2057_v24  ;;  %v1069_v44 = vadd.bf16 %v1005_v38, %v2554_v11 }
 0x11b   :  { %v2578_v41 = vpack.c.bf16 %v471_v37, %v467_v36  ;;  %1550 = vmatprep.mubr.bf16.mxu0 %v1320_v35  ;;  %v1070_v43 = vadd.bf16 %v1006_v14, %v2558_v16  ;;  %v1258_v47 = vadd.bf16 1065369472, %v2065_v39  ;;  %v2067_v60 = vpop.eup %2066 }
 0x11c   :  { %v879_v45 = vmul.bf16 1027030327, %v2576_v40  ;;  %v1133_v54 = vmul.bf16 1061961548, %v1069_v44  ;;  %v1257_v18 = vadd.bf16 1065369472, %v2067_v60 }
 0x11d   :  { %v880_v48 = vmul.bf16 1027030327, %v2578_v41  ;;  %v474_v49 = vpop.f32.mrb[20].mxu0  ;;  %v1134_v50 = vmul.bf16 1061961548, %v1070_v43  ;;  %v1322_v6 = vmul.bf16 %v1258_v47, %v810_v58 }
 0x11e   :  { %v476_v53 = vpop.f32.mrb[21].mxu0  ;;  %v943_v55 = vmul.bf16 %v879_v45, %v2576_v40  ;;  %v475_v61 = vadd.f32 %v474_v49, %v2486_v1  ;;  %v1321_v34 = vmul.bf16 %v1257_v18, %v809_v26  ;;  %v814_v44 = vmul.bf16 1056980736, %v2558_v16 }
 0x11f   :  { %v478_v56 = vpop.f32.mrb[22].mxu0  ;;  %2072 = vtanh.bf16 %v1134_v50  ;;  %v944_v59 = vmul.bf16 %v880_v48, %v2578_v41  ;;  %v477_v3 = vadd.f32 %v476_v53, %v2488_v4  ;;  %v813_v48 = vmul.bf16 1056980736, %v2554_v11 }
 0x120   :  { %v479_v13 = vadd.f32 %v478_v56, %v2486_v1  ;;  %v480_v62 = vpop.f32.mrb[23].mxu0  ;;  %2074 = vtanh.bf16 %v1133_v54  ;;  %v1007_v63 = vmul.bf16 %v943_v55, %v2576_v40 }
 0x121   :  { %v2069_v0 = vpop.eup %2068  ;;  %v481_v5 = vadd.f32 %v480_v62, %v2488_v4  ;;  %v1008_v31 = vmul.bf16 %v944_v59, %v2578_v41 }
 0x122   :  { %v2594_v7 = vpack.c.bf16 %v479_v13, %v475_v61  ;;  %1551 = vmatmul.mubr.bf16.vlgmr.msra.gmra.mrb[128].mxu0 %v1319_v57  ;;  %v1071_v10 = vadd.bf16 %v1007_v63, %v2576_v40  ;;  %v2071_v12 = vpop.eup %2070  ;;  %v1259_v17 = vadd.bf16 1065369472, %v2069_v0 }
 0x123   :  { %v2599_v15 = vpack.c.bf16 %v481_v5, %v477_v3  ;;  %1558 = vmatprep.mubr.bf16.mxu0 %v1322_v6  ;;  %v1072_v19 = vadd.bf16 %v1008_v31, %v2578_v41  ;;  %v1260_v21 = vadd.bf16 1065369472, %v2071_v12 }
 0x124   :  { %v881_v20 = vmul.bf16 1027030327, %v2594_v7  ;;  %v1135_v22 = vmul.bf16 1061961548, %v1071_v10  ;;  %v1323_v27 = vmul.bf16 %v1259_v17, %v811_v9  ;;  %v816_v9 = vmul.bf16 1056980736, %v2578_v41 }
 0x125   :  { %v882_v23 = vmul.bf16 1027030327, %v2599_v15  ;;  %v484_v24 = vpop.f32.mrb[24].mxu0  ;;  %v1136_v52 = vmul.bf16 1061961548, %v1072_v19  ;;  %v1324_v51 = vmul.bf16 %v1260_v21, %v812_v8 }
 0x126   :  { %v486_v25 = vpop.f32.mrb[25].mxu0  ;;  %2076 = vtanh.bf16 %v1135_v22  ;;  %v485_v29 = vadd.f32 %v484_v24, %v2486_v1  ;;  %v945_v35 = vmul.bf16 %v881_v20, %v2594_v7  ;;  %v815_v21 = vmul.bf16 1056980736, %v2576_v40 }
 0x127   :  { %v488_v2 = vpop.f32.mrb[26].mxu0  ;;  %2078 = vtanh.bf16 %v1136_v52  ;;  %v946_v28 = vmul.bf16 %v882_v23, %v2599_v15  ;;  %1566 = vmatprep.mubr.bf16.mxu1 %v1324_v51  ;;  %v487_v36 = vadd.f32 %v486_v25, %v2488_v4 }
 0x128   :  { %v489_v32 = vadd.f32 %v488_v2, %v2486_v1  ;;  %v490_v33 = vpop.f32.mrb[27].mxu0  ;;  %1567 = vmatmul.mubr.bf16.vlgmr.msra.gmra.mrb[0].mxu1 %v1323_v27  ;;  %v1009_v39 = vmul.bf16 %v945_v35, %v2594_v7 }
 0x129   :  { %v491_v37 = vadd.f32 %v490_v33, %v2488_v4  ;;  %v1010_v30 = vmul.bf16 %v946_v28, %v2599_v15 }
 0x12a   :  { %v2073_v14 = vpop.eup %2072  ;;  %v2612_v38 = vpack.c.bf16 %v489_v32, %v485_v29  ;;  %1559 = vmatmul.mubr.bf16.gmra.mrb[132].mxu0 %v1321_v34  ;;  %v1073_v50 = vadd.bf16 %v1009_v39, %v2594_v7 }
 0x12b   :  { %v2075_v42 = vpop.eup %2074  ;;  %v2615_v43 = vpack.c.bf16 %v491_v37, %v487_v36  ;;  %v1262_v45 = vadd.bf16 1065369472, %v2073_v14  ;;  %v1074_v46 = vadd.bf16 %v1010_v30, %v2599_v15  ;;  %v818_v30 = vmul.bf16 1056980736, %v2599_v15 }
 0x12c   :  { %v883_v47 = vmul.bf16 1027030327, %v2612_v38  ;;  %v1261_v49 = vadd.bf16 1065369472, %v2075_v42  ;;  %v1137_v58 = vmul.bf16 1061961548, %v1073_v50 }
 0x12d   :  { %v884_v53 = vmul.bf16 1027030327, %v2615_v43  ;;  %v494_v54 = vpop.f32.mrb[28].mxu0  ;;  %v1326_v55 = vmul.bf16 %v1262_v45, %v814_v44  ;;  %v1138_v56 = vmul.bf16 1061961548, %v1074_v46 }
 0x12e   :  { %v496_v57 = vpop.f32.mrb[29].mxu0  ;;  %v1325_v16 = vmul.bf16 %v1261_v49, %v813_v48  ;;  %v947_v61 = vmul.bf16 %v883_v47, %v2612_v38  ;;  %v495_v11 = vadd.f32 %v494_v54, %v2486_v1  ;;  %v817_v45 = vmul.bf16 1056980736, %v2594_v7 }
 0x12f   :  { %v498_v59 = vpop.f32.mrb[30].mxu0  ;;  %1574 = vmatprep.mubr.bf16.mxu1 %v1326_v55  ;;  %2080 = vtanh.bf16 %v1138_v56  ;;  %v948_v60 = vmul.bf16 %v884_v53, %v2615_v43  ;;  %v497_v0 = vadd.f32 %v496_v57, %v2488_v4 }
 0x130   :  { %v499_v13 = vadd.f32 %v498_v59, %v2486_v1  ;;  %v500_v62 = vpop.f32.mrb[31].mxu0  ;;  %2082 = vtanh.bf16 %v1137_v58  ;;  %1575 = vmatmul.mubr.bf16.gmra.mrb[4].mxu1 %v1325_v16  ;;  %v1011_v6 = vmul.bf16 %v947_v61, %v2612_v38 }
 0x131   :  { %v2077_v63 = vpop.eup %2076  ;;  %v501_v3 = vadd.f32 %v500_v62, %v2488_v4  ;;  %v1012_v5 = vmul.bf16 %v948_v60, %v2615_v43 }
 0x132   :  { %v2079_v31 = vpop.eup %2078  ;;  %v2631_v8 = vpack.c.bf16 %v499_v13, %v495_v11  ;;  %v1263_v10 = vadd.bf16 1065369472, %v2077_v63  ;;  %v1075_v19 = vadd.bf16 %v1011_v6, %v2612_v38  ;;  %v820_v6 = vmul.bf16 1056980736, %v2615_v43 }
 0x133   :  { %v2634_v12 = vpack.c.bf16 %v501_v3, %v497_v0  ;;  %v1264_v17 = vadd.bf16 1065369472, %v2079_v31  ;;  %v1076_v18 = vadd.bf16 %v1012_v5, %v2615_v43 }
 0x134   :  { %v885_v20 = vmul.bf16 1027030327, %v2631_v8  ;;  %v1139_v51 = vmul.bf16 1061961548, %v1075_v19  ;;  %v1327_v2 = vmul.bf16 %v1263_v10, %v815_v21 }
 0x135   :  { %v886_v22 = vmul.bf16 1027030327, %v2634_v12  ;;  %v504_v23 = vpop.f32.mrb[32].mxu0  ;;  %v1328_v24 = vmul.bf16 %v1264_v17, %v816_v9  ;;  %v1140_v52 = vmul.bf16 1061961548, %v1076_v18 }
 0x136   :  { %v506_v25 = vpop.f32.mrb[33].mxu0  ;;  %v949_v41 = vmul.bf16 %v885_v20, %v2631_v8  ;;  %v505_v28 = vadd.f32 %v504_v23, %v2486_v1  ;;  %v819_v17 = vmul.bf16 1056980736, %v2612_v38 }
 0x137   :  { %v508_v26 = vpop.f32.mrb[34].mxu0  ;;  %1582 = vmatprep.mubr.bf16.mxu1 %v1328_v24  ;;  %2084 = vtanh.bf16 %v1140_v52  ;;  %v950_v27 = vmul.bf16 %v886_v22, %v2634_v12  ;;  %v507_v33 = vadd.f32 %v506_v25, %v2488_v4 }
 0x138   :  { %v509_v29 = vadd.f32 %v508_v26, %v2486_v1  ;;  %v510_v40 = vpop.f32.mrb[35].mxu0  ;;  %2086 = vtanh.bf16 %v1139_v51  ;;  %v1013_v32 = vmul.bf16 %v949_v41, %v2631_v8  ;;  %1583 = vmatmul.mubr.bf16.gmra.mrb[8].mxu1 %v1327_v2 }
 0x139   :  { %v511_v34 = vadd.f32 %v510_v40, %v2488_v4  ;;  %v1014_v35 = vmul.bf16 %v950_v27, %v2634_v12 }
 0x13a   :  { %v2081_v36 = vpop.eup %2080  ;;  %v2649_v37 = vpack.c.bf16 %v509_v29, %v505_v28  ;;  %v1077_v14 = vadd.bf16 %v1013_v32, %v2631_v8 }
 0x13b   :  { %v2083_v39 = vpop.eup %2082  ;;  %v2653_v42 = vpack.c.bf16 %v511_v34, %v507_v33  ;;  %v1266_v44 = vadd.bf16 1065369472, %v2081_v36  ;;  %v1078_v46 = vadd.bf16 %v1014_v35, %v2634_v12  ;;  %v822_v35 = vmul.bf16 1056980736, %v2634_v12 }
 0x13c   :  { %v887_v47 = vmul.bf16 1027030327, %v2649_v37  ;;  %v1265_v48 = vadd.bf16 1065369472, %v2083_v39  ;;  %v1141_v49 = vmul.bf16 1061961548, %v1077_v14 }
 0x13d   :  { %v888_v50 = vmul.bf16 1027030327, %v2653_v42  ;;  %v514_v53 = vpop.f32.mrb[36].mxu0  ;;  %v1330_v54 = vmul.bf16 %v1266_v44, %v818_v30  ;;  %v1142_v55 = vmul.bf16 1061961548, %v1078_v46 }
 0x13e   :  { %v516_v15 = vpop.f32.mrb[37].mxu0  ;;  %2088 = vtanh.bf16 %v1141_v49  ;;  %v1329_v57 = vmul.bf16 %v1265_v48, %v817_v45  ;;  %v515_v7 = vadd.f32 %v514_v53, %v2486_v1  ;;  %v951_v60 = vmul.bf16 %v887_v47, %v2649_v37 }
 0x13f   :  { %v518_v56 = vpop.f32.mrb[38].mxu0  ;;  %1590 = vmatprep.mubr.bf16.mxu1 %v1330_v54  ;;  %2090 = vtanh.bf16 %v1142_v55  ;;  %v952_v58 = vmul.bf16 %v888_v50, %v2653_v42  ;;  %v517_v61 = vadd.f32 %v516_v15, %v2488_v4  ;;  %v821_v46 = vmul.bf16 1056980736, %v2631_v8 }
 0x140   :  { %v519_v59 = vadd.f32 %v518_v56, %v2486_v1  ;;  %v520_v16 = vpop.f32.mrb[39].mxu0  ;;  %1591 = vmatmul.mubr.bf16.gmra.mrb[12].mxu1 %v1329_v57  ;;  %v1015_v0 = vmul.bf16 %v951_v60, %v2649_v37 }
 0x141   :  { %v521_v11 = vadd.f32 %v520_v16, %v2488_v4  ;;  %v1016_v13 = vmul.bf16 %v952_v58, %v2653_v42 }
 0x142   :  { %v2085_v62 = vpop.eup %2084  ;;  %v2666_v63 = vpack.c.bf16 %v519_v59, %v515_v7  ;;  %v1079_v19 = vadd.bf16 %v1015_v0, %v2649_v37 }
 0x143   :  { %v2087_v3 = vpop.eup %2086  ;;  %v2669_v5 = vpack.c.bf16 %v521_v11, %v517_v61  ;;  %v1268_v31 = vadd.bf16 1065369472, %v2085_v62  ;;  %v1080_v9 = vadd.bf16 %v1016_v13, %v2653_v42  ;;  %v824_v13 = vmul.bf16 1056980736, %v2653_v42 }
 0x144   :  { %v889_v10 = vmul.bf16 1027030327, %v2666_v63  ;;  %v1267_v18 = vadd.bf16 1065369472, %v2087_v3  ;;  %v1143_v52 = vmul.bf16 1061961548, %v1079_v19 }
 0x145   :  { %v890_v20 = vmul.bf16 1027030327, %v2669_v5  ;;  %v524_v21 = vpop.f32.mrb[40].mxu0  ;;  %v1332_v22 = vmul.bf16 %v1268_v31, %v820_v6  ;;  %v1144_v23 = vmul.bf16 1061961548, %v1080_v9 }
 0x146   :  { %v526_v24 = vpop.f32.mrb[41].mxu0  ;;  %v1331_v43 = vmul.bf16 %v1267_v18, %v819_v17  ;;  %v953_v41 = vmul.bf16 %v889_v10, %v2666_v63  ;;  %v525_v38 = vadd.f32 %v524_v21, %v2486_v1  ;;  %v823_v31 = vmul.bf16 1056980736, %v2649_v37 }
 0x147   :  { %v528_v25 = vpop.f32.mrb[42].mxu0  ;;  %1598 = vmatprep.mubr.bf16.mxu1 %v1332_v22  ;;  %2092 = vtanh.bf16 %v1144_v23  ;;  %v954_v51 = vmul.bf16 %v890_v20, %v2669_v5  ;;  %v527_v28 = vadd.f32 %v526_v24, %v2488_v4 }
 0x148   :  { %v529_v26 = vadd.f32 %v528_v25, %v2486_v1  ;;  %v530_v2 = vpop.f32.mrb[43].mxu0  ;;  %2094 = vtanh.bf16 %v1143_v52  ;;  %1599 = vmatmul.mubr.bf16.gmra.mrb[16].mxu1 %v1331_v43  ;;  %v1017_v32 = vmul.bf16 %v953_v41, %v2666_v63 }
 0x149   :  { %v2089_v27 = vpop.eup %2088  ;;  %v531_v29 = vadd.f32 %v530_v2, %v2488_v4  ;;  %v1018_v40 = vmul.bf16 %v954_v51, %v2669_v5 }
 0x14a   :  { %v2091_v33 = vpop.eup %2090  ;;  %v2685_v34 = vpack.c.bf16 %v529_v26, %v525_v38  ;;  %v1269_v36 = vadd.bf16 1065369472, %v2089_v27  ;;  %v1081_v44 = vadd.bf16 %v1017_v32, %v2666_v63  ;;  %v826_v32 = vmul.bf16 1056980736, %v2669_v5 }
 0x14b   :  { %v2688_v30 = vpack.c.bf16 %v531_v29, %v527_v28  ;;  %v1270_v14 = vadd.bf16 1065369472, %v2091_v33  ;;  %v1082_v39 = vadd.bf16 %v1018_v40, %v2669_v5 }
 0x14c   :  { %v891_v45 = vmul.bf16 1027030327, %v2685_v34  ;;  %v1145_v54 = vmul.bf16 1061961548, %v1081_v44  ;;  %v1333_v15 = vmul.bf16 %v1269_v36, %v821_v46 }
 0x14d   :  { %v892_v47 = vmul.bf16 1027030327, %v2688_v30  ;;  %v534_v48 = vpop.f32.mrb[44].mxu0  ;;  %v1334_v49 = vmul.bf16 %v1270_v14, %v822_v35  ;;  %v1146_v50 = vmul.bf16 1061961548, %v1082_v39 }
 0x14e   :  { %v536_v53 = vpop.f32.mrb[45].mxu0  ;;  %v955_v12 = vmul.bf16 %v891_v45, %v2685_v34  ;;  %v535_v57 = vadd.f32 %v534_v48, %v2486_v1  ;;  %v825_v14 = vmul.bf16 1056980736, %v2666_v63 }
 0x14f   :  { %v538_v55 = vpop.f32.mrb[46].mxu0  ;;  %1606 = vmatprep.mubr.bf16.mxu1 %v1334_v49  ;;  %2096 = vtanh.bf16 %v1146_v50  ;;  %v956_v56 = vmul.bf16 %v892_v47, %v2688_v30  ;;  %v537_v59 = vadd.f32 %v536_v53, %v2488_v4 }
 0x150   :  { %v539_v58 = vadd.f32 %v538_v55, %v2486_v1  ;;  %v540_v8 = vpop.f32.mrb[47].mxu0  ;;  %2098 = vtanh.bf16 %v1145_v54  ;;  %v1019_v7 = vmul.bf16 %v955_v12, %v2685_v34  ;;  %1607 = vmatmul.mubr.bf16.gmra.mrb[20].mxu1 %v1333_v15 }
 0x151   :  { %v541_v16 = vadd.f32 %v540_v8, %v2488_v4  ;;  %v1020_v60 = vmul.bf16 %v956_v56, %v2688_v30 }
 0x152   :  { %v2093_v61 = vpop.eup %2092  ;;  %v2703_v11 = vpack.c.bf16 %v539_v58, %v535_v57  ;;  %v1083_v62 = vadd.bf16 %v1019_v7, %v2685_v34 }
 0x153   :  { %v2095_v0 = vpop.eup %2094  ;;  %v2707_v3 = vpack.c.bf16 %v541_v16, %v537_v59  ;;  %v1272_v6 = vadd.bf16 1065369472, %v2093_v61  ;;  %v1084_v9 = vadd.bf16 %v1020_v60, %v2688_v30  ;;  %v828_v60 = vmul.bf16 1056980736, %v2688_v30 }
 0x154   :  { %v893_v10 = vmul.bf16 1027030327, %v2703_v11  ;;  %v1271_v17 = vadd.bf16 1065369472, %v2095_v0  ;;  %v1147_v18 = vmul.bf16 1061961548, %v1083_v62 }
 0x155   :  { %v894_v19 = vmul.bf16 1027030327, %v2707_v3  ;;  %v544_v20 = vpop.f32.mrb[48].mxu0  ;;  %v1336_v21 = vmul.bf16 %v1272_v6, %v824_v13  ;;  %v1148_v22 = vmul.bf16 1061961548, %v1084_v9 }
 0x156   :  { %v546_v42 = vpop.f32.mrb[49].mxu0  ;;  %2100 = vtanh.bf16 %v1147_v18  ;;  %v1335_v24 = vmul.bf16 %v1271_v17, %v823_v31  ;;  %v545_v37 = vadd.f32 %v544_v20, %v2486_v1  ;;  %v957_v51 = vmul.bf16 %v893_v10, %v2703_v11 }
 0x157   :  { %v548_v23 = vpop.f32.mrb[50].mxu0  ;;  %1614 = vmatprep.mubr.bf16.mxu1 %v1336_v21  ;;  %2102 = vtanh.bf16 %v1148_v22  ;;  %v958_v52 = vmul.bf16 %v894_v19, %v2707_v3  ;;  %v547_v41 = vadd.f32 %v546_v42, %v2488_v4  ;;  %v827_v9 = vmul.bf16 1056980736, %v2685_v34 }
 0x158   :  { %v549_v25 = vadd.f32 %v548_v23, %v2486_v1  ;;  %v550_v43 = vpop.f32.mrb[51].mxu0  ;;  %1615 = vmatmul.mubr.bf16.gmra.mrb[24].mxu1 %v1335_v24  ;;  %v1021_v28 = vmul.bf16 %v957_v51, %v2703_v11 }
 0x159   :  { %v551_v38 = vadd.f32 %v550_v43, %v2488_v4  ;;  %v1022_v26 = vmul.bf16 %v958_v52, %v2707_v3 }
 0x15a   :  { %v2097_v2 = vpop.eup %2096  ;;  %v2720_v27 = vpack.c.bf16 %v549_v25, %v545_v37  ;;  %v1085_v44 = vadd.bf16 %v1021_v28, %v2703_v11 }
 0x15b   :  { %v2099_v29 = vpop.eup %2098  ;;  %v2723_v40 = vpack.c.bf16 %v551_v38, %v547_v41  ;;  %v1274_v33 = vadd.bf16 1065369472, %v2097_v2  ;;  %v1086_v35 = vadd.bf16 %v1022_v26, %v2707_v3  ;;  %v830_v26 = vmul.bf16 1056980736, %v2707_v3 }
 0x15c   :  { %v895_v36 = vmul.bf16 1027030327, %v2720_v27  ;;  %v1273_v39 = vadd.bf16 1065369472, %v2099_v29  ;;  %v1149_v50 = vmul.bf16 1061961548, %v1085_v44 }
 0x15d   :  { %v896_v45 = vmul.bf16 1027030327, %v2723_v40  ;;  %v554_v46 = vpop.f32.mrb[52].mxu0  ;;  %v1338_v47 = vmul.bf16 %v1274_v33, %v826_v32  ;;  %v1150_v48 = vmul.bf16 1061961548, %v1086_v35 }
 0x15e   :  { %v556_v49 = vpop.f32.mrb[53].mxu0  ;;  %v1337_v5 = vmul.bf16 %v1273_v39, %v825_v14  ;;  %v959_v12 = vmul.bf16 %v895_v36, %v2720_v27  ;;  %v555_v63 = vadd.f32 %v554_v46, %v2486_v1  ;;  %v829_v33 = vmul.bf16 1056980736, %v2703_v11 }
 0x15f   :  { %v558_v53 = vpop.f32.mrb[54].mxu0  ;;  %1622 = vmatprep.mubr.bf16.mxu1 %v1338_v47  ;;  %2104 = vtanh.bf16 %v1150_v48  ;;  %v960_v54 = vmul.bf16 %v896_v45, %v2723_v40  ;;  %v557_v57 = vadd.f32 %v556_v49, %v2488_v4 }
 0x160   :  { %v559_v55 = vadd.f32 %v558_v53, %v2486_v1  ;;  %v560_v15 = vpop.f32.mrb[55].mxu0  ;;  %2106 = vtanh.bf16 %v1149_v50  ;;  %1623 = vmatmul.mubr.bf16.gmra.mrb[28].mxu1 %v1337_v5  ;;  %v1023_v7 = vmul.bf16 %v959_v12, %v2720_v27 }
 0x161   :  { %v2101_v56 = vpop.eup %2100  ;;  %v561_v58 = vadd.f32 %v560_v15, %v2488_v4  ;;  %v1024_v8 = vmul.bf16 %v960_v54, %v2723_v40 }
 0x162   :  { %v2103_v59 = vpop.eup %2102  ;;  %v2739_v16 = vpack.c.bf16 %v559_v55, %v555_v63  ;;  %v1275_v61 = vadd.bf16 1065369472, %v2101_v56  ;;  %v1087_v6 = vadd.bf16 %v1023_v7, %v2720_v27  ;;  %v832_v7 = vmul.bf16 1056980736, %v2723_v40 }
 0x163   :  { %v2742_v13 = vpack.c.bf16 %v561_v58, %v557_v57  ;;  %v1276_v62 = vadd.bf16 1065369472, %v2103_v59  ;;  %v1088_v0 = vadd.bf16 %v1024_v8, %v2723_v40 }
 0x164   :  { %v897_v31 = vmul.bf16 1027030327, %v2739_v16  ;;  %v1151_v21 = vmul.bf16 1061961548, %v1087_v6  ;;  %v1339_v42 = vmul.bf16 %v1275_v61, %v827_v9 }
 0x165   :  { %v898_v10 = vmul.bf16 1027030327, %v2742_v13  ;;  %v564_v17 = vpop.f32.mrb[56].mxu0  ;;  %v1340_v18 = vmul.bf16 %v1276_v62, %v828_v60  ;;  %v1152_v19 = vmul.bf16 1061961548, %v1088_v0 }
 0x166   :  { %v566_v20 = vpop.f32.mrb[57].mxu0  ;;  %v961_v30 = vmul.bf16 %v897_v31, %v2739_v16  ;;  %v565_v24 = vadd.f32 %v564_v17, %v2486_v1  ;;  %v831_v62 = vmul.bf16 1056980736, %v2720_v27 }
 0x167   :  { %v568_v22 = vpop.f32.mrb[58].mxu0  ;;  %1630 = vmatprep.mubr.bf16.mxu1 %v1340_v18  ;;  %2108 = vtanh.bf16 %v1152_v19  ;;  %v962_v23 = vmul.bf16 %v898_v10, %v2742_v13  ;;  %v567_v25 = vadd.f32 %v566_v20, %v2488_v4 }
 0x168   :  { %v569_v52 = vadd.f32 %v568_v22, %v2486_v1  ;;  %v570_v34 = vpop.f32.mrb[59].mxu0  ;;  %2110 = vtanh.bf16 %v1151_v21  ;;  %v1025_v37 = vmul.bf16 %v961_v30, %v2739_v16  ;;  %1631 = vmatmul.mubr.bf16.gmra.mrb[32].mxu1 %v1339_v42 }
 0x169   :  { %v571_v43 = vadd.f32 %v570_v34, %v2488_v4  ;;  %v1026_v51 = vmul.bf16 %v962_v23, %v2742_v13 }
 0x16a   :  { %v2105_v41 = vpop.eup %2104  ;;  %v2757_v38 = vpack.c.bf16 %v569_v52, %v565_v24  ;;  %v1089_v2 = vadd.bf16 %v1025_v37, %v2739_v16 }
 0x16b   :  { %v2107_v28 = vpop.eup %2106  ;;  %v2761_v29 = vpack.c.bf16 %v571_v43, %v567_v25  ;;  %v1278_v32 = vadd.bf16 1065369472, %v2105_v41  ;;  %v1090_v35 = vadd.bf16 %v1026_v51, %v2742_v13  ;;  %v834_v51 = vmul.bf16 1056980736, %v2742_v13 }
 0x16c   :  { %v899_v36 = vmul.bf16 1027030327, %v2757_v38  ;;  %v1277_v14 = vadd.bf16 1065369472, %v2107_v28  ;;  %v1153_v39 = vmul.bf16 1061961548, %v1089_v2 }
 0x16d   :  { %v900_v44 = vmul.bf16 1027030327, %v2761_v29  ;;  %v574_v45 = vpop.f32.mrb[60].mxu0  ;;  %v1342_v46 = vmul.bf16 %v1278_v32, %v830_v26  ;;  %v1154_v47 = vmul.bf16 1061961548, %v1090_v35 }
 0x16e   :  { %v576_v3 = vpop.f32.mrb[61].mxu0  ;;  %2112 = vtanh.bf16 %v1153_v39  ;;  %v1341_v49 = vmul.bf16 %v1277_v14, %v829_v33  ;;  %v575_v11 = vadd.f32 %v574_v45, %v2486_v1  ;;  %v963_v54 = vmul.bf16 %v899_v36, %v2757_v38 }
 0x16f   :  { %v578_v48 = vpop.f32.mrb[62].mxu0  ;;  %1638 = vmatprep.mubr.bf16.mxu1 %v1342_v46  ;;  %2114 = vtanh.bf16 %v1154_v47  ;;  %v964_v50 = vmul.bf16 %v900_v44, %v2761_v29  ;;  %v577_v12 = vadd.f32 %v576_v3, %v2488_v4  ;;  %v833_v35 = vmul.bf16 1056980736, %v2739_v16 }
 0x170   :  { %v579_v53 = vadd.f32 %v578_v48, %v2486_v1  ;;  %v580_v5 = vpop.f32.mrb[63].mxu0  ;;  %1639 = vmatmul.mubr.bf16.gmra.mrb[36].mxu1 %v1341_v49  ;;  %v1027_v57 = vmul.bf16 %v963_v54, %v2757_v38 }
 0x171   :  { %v581_v63 = vadd.f32 %v580_v5, %v2488_v4  ;;  %v1028_v55 = vmul.bf16 %v964_v50, %v2761_v29 }
 0x172   :  { %v2109_v15 = vpop.eup %2108  ;;  %v2774_v56 = vpack.c.bf16 %v579_v53, %v575_v11  ;;  %v1091_v6 = vadd.bf16 %v1027_v57, %v2757_v38 }
 0x173   :  { %v2111_v58 = vpop.eup %2110  ;;  %v2777_v8 = vpack.c.bf16 %v581_v63, %v577_v12  ;;  %v1280_v59 = vadd.bf16 1065369472, %v2109_v15  ;;  %v1092_v60 = vadd.bf16 %v1028_v55, %v2761_v29  ;;  %v836_v55 = vmul.bf16 1056980736, %v2761_v29 }
 0x174   :  { %v901_v61 = vmul.bf16 1027030327, %v2774_v56  ;;  %v1279_v0 = vadd.bf16 1065369472, %v2111_v58  ;;  %v1155_v19 = vmul.bf16 1061961548, %v1091_v6 }
 0x175   :  { %v902_v31 = vmul.bf16 1027030327, %v2777_v8  ;;  %v584_v9 = vpop.f32.mrb[64].mxu0  ;;  %v1344_v10 = vmul.bf16 %v1280_v59, %v832_v7  ;;  %v1156_v17 = vmul.bf16 1061961548, %v1092_v60 }
 0x176   :  { %v586_v18 = vpop.f32.mrb[65].mxu0  ;;  %v1343_v40 = vmul.bf16 %v1279_v0, %v831_v62  ;;  %v965_v30 = vmul.bf16 %v901_v61, %v2774_v56  ;;  %v585_v27 = vadd.f32 %v584_v9, %v2486_v1  ;;  %v835_v59 = vmul.bf16 1056980736, %v2757_v38 }
 0x177   :  { %v588_v20 = vpop.f32.mrb[66].mxu0  ;;  %1646 = vmatprep.mubr.bf16.mxu1 %v1344_v10  ;;  %2116 = vtanh.bf16 %v1156_v17  ;;  %v966_v21 = vmul.bf16 %v902_v31, %v2777_v8  ;;  %v587_v24 = vadd.f32 %v586_v18, %v2488_v4 }
 0x178   :  { %v589_v22 = vadd.f32 %v588_v20, %v2486_v1  ;;  %v590_v42 = vpop.f32.mrb[67].mxu0  ;;  %2118 = vtanh.bf16 %v1155_v19  ;;  %1647 = vmatmul.mubr.bf16.gmra.mrb[40].mxu1 %v1343_v40  ;;  %v1029_v37 = vmul.bf16 %v965_v30, %v2774_v56 }
 0x179   :  { %v2113_v23 = vpop.eup %2112  ;;  %v591_v52 = vadd.f32 %v590_v42, %v2488_v4  ;;  %v1030_v34 = vmul.bf16 %v966_v21, %v2777_v8 }
 0x17a   :  { %v2115_v25 = vpop.eup %2114  ;;  %v2793_v43 = vpack.c.bf16 %v589_v22, %v585_v27  ;;  %v1281_v41 = vadd.bf16 1065369472, %v2113_v23  ;;  %v1093_v32 = vadd.bf16 %v1029_v37, %v2774_v56  ;;  %v838_v37 = vmul.bf16 1056980736, %v2777_v8 }
 0x17b   :  { %v2796_v26 = vpack.c.bf16 %v591_v52, %v587_v24  ;;  %v1282_v2 = vadd.bf16 1065369472, %v2115_v25  ;;  %v1094_v28 = vadd.bf16 %v1030_v34, %v2777_v8 }
 0x17c   :  { %v903_v33 = vmul.bf16 1027030327, %v2793_v43  ;;  %v1157_v46 = vmul.bf16 1061961548, %v1093_v32  ;;  %v1345_v3 = vmul.bf16 %v1281_v41, %v833_v35 }
 0x17d   :  { %v904_v36 = vmul.bf16 1027030327, %v2796_v26  ;;  %v594_v14 = vpop.f32.mrb[68].mxu0  ;;  %v1346_v39 = vmul.bf16 %v1282_v2, %v834_v51  ;;  %v1158_v44 = vmul.bf16 1061961548, %v1094_v28 }
 0x17e   :  { %v596_v45 = vpop.f32.mrb[69].mxu0  ;;  %v967_v13 = vmul.bf16 %v903_v33, %v2793_v43  ;;  %v595_v49 = vadd.f32 %v594_v14, %v2486_v1  ;;  %v837_v2 = vmul.bf16 1056980736, %v2774_v56 }
 0x17f   :  { %v598_v47 = vpop.f32.mrb[70].mxu0  ;;  %1654 = vmatprep.mubr.bf16.mxu1 %v1346_v39  ;;  %2120 = vtanh.bf16 %v1158_v44  ;;  %v968_v48 = vmul.bf16 %v904_v36, %v2796_v26  ;;  %v597_v53 = vadd.f32 %v596_v45, %v2488_v4 }
 0x180   :  { %v599_v50 = vadd.f32 %v598_v47, %v2486_v1  ;;  %v600_v16 = vpop.f32.mrb[71].mxu0  ;;  %2122 = vtanh.bf16 %v1157_v46  ;;  %v1031_v11 = vmul.bf16 %v967_v13, %v2793_v43  ;;  %1655 = vmatmul.mubr.bf16.gmra.mrb[44].mxu1 %v1345_v3 }
 0x181   :  { %v601_v5 = vadd.f32 %v600_v16, %v2488_v4  ;;  %v1032_v54 = vmul.bf16 %v968_v48, %v2796_v26 }
 0x182   :  { %v2117_v12 = vpop.eup %2116  ;;  %v2811_v63 = vpack.c.bf16 %v599_v50, %v595_v49  ;;  %v1095_v15 = vadd.bf16 %v1031_v11, %v2793_v43 }
 0x183   :  { %v2119_v57 = vpop.eup %2118  ;;  %v2815_v58 = vpack.c.bf16 %v601_v5, %v597_v53  ;;  %v1284_v7 = vadd.bf16 1065369472, %v2117_v12  ;;  %v1096_v60 = vadd.bf16 %v1032_v54, %v2796_v26  ;;  %v840_v54 = vmul.bf16 1056980736, %v2796_v26 }
 0x184   :  { %v905_v61 = vmul.bf16 1027030327, %v2811_v63  ;;  %v1283_v62 = vadd.bf16 1065369472, %v2119_v57  ;;  %v1159_v0 = vmul.bf16 1061961548, %v1095_v15 }
 0x185   :  { %v906_v6 = vmul.bf16 1027030327, %v2815_v58  ;;  %v604_v31 = vpop.f32.mrb[72].mxu0  ;;  %v1348_v9 = vmul.bf16 %v1284_v7, %v836_v55  ;;  %v1160_v10 = vmul.bf16 1061961548, %v1096_v60 }
 0x186   :  { %v606_v29 = vpop.f32.mrb[73].mxu0  ;;  %2124 = vtanh.bf16 %v1159_v0  ;;  %v1347_v18 = vmul.bf16 %v1283_v62, %v835_v59  ;;  %v605_v38 = vadd.f32 %v604_v31, %v2486_v1  ;;  %v969_v21 = vmul.bf16 %v905_v61, %v2811_v63 }
 0x187   :  { %v608_v17 = vpop.f32.mrb[74].mxu0  ;;  %1662 = vmatprep.mubr.bf16.mxu1 %v1348_v9  ;;  %2126 = vtanh.bf16 %v1160_v10  ;;  %v970_v19 = vmul.bf16 %v906_v6, %v2815_v58  ;;  %v607_v30 = vadd.f32 %v606_v29, %v2488_v4  ;;  %v839_v60 = vmul.bf16 1056980736, %v2793_v43 }
 0x188   :  { %v609_v20 = vadd.f32 %v608_v17, %v2486_v1  ;;  %v610_v40 = vpop.f32.mrb[75].mxu0  ;;  %1663 = vmatmul.mubr.bf16.gmra.mrb[48].mxu1 %v1347_v18  ;;  %v1033_v24 = vmul.bf16 %v969_v21, %v2811_v63 }
 0x189   :  { %v611_v27 = vadd.f32 %v610_v40, %v2488_v4  ;;  %v1034_v22 = vmul.bf16 %v970_v19, %v2815_v58 }
 0x18a   :  { %v2121_v42 = vpop.eup %2120  ;;  %v2828_v23 = vpack.c.bf16 %v609_v20, %v605_v38  ;;  %v1097_v32 = vadd.bf16 %v1033_v24, %v2811_v63 }
 0x18b   :  { %v2123_v52 = vpop.eup %2122  ;;  %v2831_v34 = vpack.c.bf16 %v611_v27, %v607_v30  ;;  %v1286_v25 = vadd.bf16 1065369472, %v2121_v42  ;;  %v1098_v51 = vadd.bf16 %v1034_v22, %v2815_v58  ;;  %v842_v22 = vmul.bf16 1056980736, %v2815_v58 }
 0x18c   :  { %v907_v41 = vmul.bf16 1027030327, %v2828_v23  ;;  %v1285_v28 = vadd.bf16 1065369472, %v2123_v52  ;;  %v1161_v44 = vmul.bf16 1061961548, %v1097_v32 }
 0x18d   :  { %v908_v33 = vmul.bf16 1027030327, %v2831_v34  ;;  %v614_v35 = vpop.f32.mrb[76].mxu0  ;;  %v1350_v36 = vmul.bf16 %v1286_v25, %v838_v37  ;;  %v1162_v14 = vmul.bf16 1061961548, %v1098_v51 }
 0x18e   :  { %v616_v39 = vpop.f32.mrb[77].mxu0  ;;  %v1349_v8 = vmul.bf16 %v1285_v28, %v837_v2  ;;  %v971_v13 = vmul.bf16 %v907_v41, %v2828_v23  ;;  %v615_v56 = vadd.f32 %v614_v35, %v2486_v1  ;;  %v841_v25 = vmul.bf16 1056980736, %v2811_v63 }
 0x18f   :  { %v618_v45 = vpop.f32.mrb[78].mxu0  ;;  %1670 = vmatprep.mubr.bf16.mxu1 %v1350_v36  ;;  %2128 = vtanh.bf16 %v1162_v14  ;;  %v972_v46 = vmul.bf16 %v908_v33, %v2831_v34  ;;  %v617_v49 = vadd.f32 %v616_v39, %v2488_v4 }
 0x190   :  { %v619_v47 = vadd.f32 %v618_v45, %v2486_v1  ;;  %v620_v3 = vpop.f32.mrb[79].mxu0  ;;  %2130 = vtanh.bf16 %v1161_v44  ;;  %1671 = vmatmul.mubr.bf16.gmra.mrb[52].mxu1 %v1349_v8  ;;  %v1035_v11 = vmul.bf16 %v971_v13, %v2828_v23 }
 0x191   :  { %v2125_v48 = vpop.eup %2124  ;;  %v621_v50 = vadd.f32 %v620_v3, %v2488_v4  ;;  %v1036_v16 = vmul.bf16 %v972_v46, %v2831_v34 }
 0x192   :  { %v2127_v53 = vpop.eup %2126  ;;  %v2847_v5 = vpack.c.bf16 %v619_v47, %v615_v56  ;;  %v1287_v12 = vadd.bf16 1065369472, %v2125_v48  ;;  %v1099_v7 = vadd.bf16 %v1035_v11, %v2828_v23  ;;  %v844_v11 = vmul.bf16 1056980736, %v2831_v34 }
 0x193   :  { %v2850_v55 = vpack.c.bf16 %v621_v50, %v617_v49  ;;  %v1288_v15 = vadd.bf16 1065369472, %v2127_v53  ;;  %v1100_v57 = vadd.bf16 %v1036_v16, %v2831_v34 }
 0x194   :  { %v909_v59 = vmul.bf16 1027030327, %v2847_v5  ;;  %v1163_v9 = vmul.bf16 1061961548, %v1099_v7  ;;  %v1351_v29 = vmul.bf16 %v1287_v12, %v839_v60 }
 0x195   :  { %v910_v61 = vmul.bf16 1027030327, %v2850_v55  ;;  %v624_v62 = vpop.f32.mrb[80].mxu0  ;;  %v1352_v0 = vmul.bf16 %v1288_v15, %v840_v54  ;;  %v1164_v6 = vmul.bf16 1061961548, %v1100_v57 }
 0x196   :  { %v626_v31 = vpop.f32.mrb[81].mxu0  ;;  %v973_v26 = vmul.bf16 %v909_v59, %v2847_v5  ;;  %v625_v18 = vadd.f32 %v624_v62, %v2486_v1  ;;  %v843_v15 = vmul.bf16 1056980736, %v2828_v23 }
 0x197   :  { %v628_v10 = vpop.f32.mrb[82].mxu0  ;;  %1678 = vmatprep.mubr.bf16.mxu1 %v1352_v0  ;;  %2132 = vtanh.bf16 %v1164_v6  ;;  %v974_v17 = vmul.bf16 %v910_v61, %v2850_v55  ;;  %v627_v20 = vadd.f32 %v626_v31, %v2488_v4 }
 0x198   :  { %v629_v19 = vadd.f32 %v628_v10, %v2486_v1  ;;  %v630_v43 = vpop.f32.mrb[83].mxu0  ;;  %2134 = vtanh.bf16 %v1163_v9  ;;  %v1037_v38 = vmul.bf16 %v973_v26, %v2847_v5  ;;  %1679 = vmatmul.mubr.bf16.gmra.mrb[56].mxu1 %v1351_v29 }
 0x199   :  { %v631_v40 = vadd.f32 %v630_v43, %v2488_v4  ;;  %v1038_v21 = vmul.bf16 %v974_v17, %v2850_v55 }
 0x19a   :  { %v2129_v30 = vpop.eup %2128  ;;  %v2865_v27 = vpack.c.bf16 %v629_v19, %v625_v18  ;;  %v1101_v42 = vadd.bf16 %v1037_v38, %v2847_v5 }
 0x19b   :  { %v2131_v24 = vpop.eup %2130  ;;  %v2869_v52 = vpack.c.bf16 %v631_v40, %v627_v20  ;;  %v1290_v37 = vadd.bf16 1065369472, %v2129_v30  ;;  %v1102_v51 = vadd.bf16 %v1038_v21, %v2850_v55  ;;  %v846_v21 = vmul.bf16 1056980736, %v2850_v55 }
 0x19c   :  { %v911_v41 = vmul.bf16 1027030327, %v2865_v27  ;;  %v1289_v2 = vadd.bf16 1065369472, %v2131_v24  ;;  %v1165_v28 = vmul.bf16 1061961548, %v1101_v42 }
 0x19d   :  { %v912_v32 = vmul.bf16 1027030327, %v2869_v52  ;;  %v634_v33 = vpop.f32.mrb[84].mxu0  ;;  %v1354_v35 = vmul.bf16 %v1290_v37, %v842_v22  ;;  %v1166_v36 = vmul.bf16 1061961548, %v1102_v51 }
 0x19e   :  { %v636_v58 = vpop.f32.mrb[85].mxu0  ;;  %2136 = vtanh.bf16 %v1165_v28  ;;  %v1353_v39 = vmul.bf16 %v1289_v2, %v841_v25  ;;  %v635_v63 = vadd.f32 %v634_v33, %v2486_v1  ;;  %v975_v46 = vmul.bf16 %v911_v41, %v2865_v27 }
 0x19f   :  { %v638_v14 = vpop.f32.mrb[86].mxu0  ;;  %1686 = vmatprep.mubr.bf16.mxu1 %v1354_v35  ;;  %2138 = vtanh.bf16 %v1166_v36  ;;  %v976_v44 = vmul.bf16 %v912_v32, %v2869_v52  ;;  %v637_v13 = vadd.f32 %v636_v58, %v2488_v4  ;;  %v845_v51 = vmul.bf16 1056980736, %v2847_v5 }
 0x1a0   :  { %v639_v45 = vadd.f32 %v638_v14, %v2486_v1  ;;  %v640_v8 = vpop.f32.mrb[87].mxu0  ;;  %1687 = vmatmul.mubr.bf16.gmra.mrb[60].mxu1 %v1353_v39  ;;  %v1039_v49 = vmul.bf16 %v975_v46, %v2865_v27 }
 0x1a1   :  { %v641_v56 = vadd.f32 %v640_v8, %v2488_v4  ;;  %v1040_v47 = vmul.bf16 %v976_v44, %v2869_v52 }
 0x1a2   :  { %v2133_v3 = vpop.eup %2132  ;;  %v2882_v48 = vpack.c.bf16 %v639_v45, %v635_v63  ;;  %v1103_v7 = vadd.bf16 %v1039_v49, %v2865_v27 }
 0x1a3   :  { %v2135_v50 = vpop.eup %2134  ;;  %v2885_v16 = vpack.c.bf16 %v641_v56, %v637_v13  ;;  %v1292_v53 = vadd.bf16 1065369472, %v2133_v3  ;;  %v1104_v54 = vadd.bf16 %v1040_v47, %v2869_v52  ;;  %v848_v47 = vmul.bf16 1056980736, %v2869_v52 }
 0x1a4   :  { %v913_v12 = vmul.bf16 1027030327, %v2882_v48  ;;  %v1291_v57 = vadd.bf16 1065369472, %v2135_v50  ;;  %v1167_v6 = vmul.bf16 1061961548, %v1103_v7 }
 0x1a5   :  { %v914_v59 = vmul.bf16 1027030327, %v2885_v16  ;;  %v644_v60 = vpop.f32.mrb[88].mxu0  ;;  %v1356_v61 = vmul.bf16 %v1292_v53, %v844_v11  ;;  %v1168_v62 = vmul.bf16 1061961548, %v1104_v54 }
 0x1a6   :  { %v646_v0 = vpop.f32.mrb[89].mxu0  ;;  %v1355_v34 = vmul.bf16 %v1291_v57, %v843_v15  ;;  %v977_v26 = vmul.bf16 %v913_v12, %v2882_v48  ;;  %v645_v23 = vadd.f32 %v644_v60, %v2486_v1  ;;  %v847_v53 = vmul.bf16 1056980736, %v2865_v27 }
 0x1a7   :  { %v648_v31 = vpop.f32.mrb[90].mxu0  ;;  %1694 = vmatprep.mubr.bf16.mxu1 %v1356_v61  ;;  %2140 = vtanh.bf16 %v1168_v62  ;;  %v978_v9 = vmul.bf16 %v914_v59, %v2885_v16  ;;  %v647_v18 = vadd.f32 %v646_v0, %v2488_v4 }
 0x1a8   :  { %v649_v10 = vadd.f32 %v648_v31, %v2486_v1  ;;  %v650_v29 = vpop.f32.mrb[91].mxu0  ;;  %2142 = vtanh.bf16 %v1167_v6  ;;  %1695 = vmatmul.mubr.bf16.gmra.mrb[64].mxu1 %v1355_v34  ;;  %v1041_v38 = vmul.bf16 %v977_v26, %v2882_v48 }
 0x1a9   :  { %v2137_v17 = vpop.eup %2136  ;;  %v651_v19 = vadd.f32 %v650_v29, %v2488_v4  ;;  %v1042_v43 = vmul.bf16 %v978_v9, %v2885_v16 }
 0x1aa   :  { %v2139_v20 = vpop.eup %2138  ;;  %v2901_v40 = vpack.c.bf16 %v649_v10, %v645_v23  ;;  %v1293_v30 = vadd.bf16 1065369472, %v2137_v17  ;;  %v1105_v37 = vadd.bf16 %v1041_v38, %v2882_v48  ;;  %v850_v38 = vmul.bf16 1056980736, %v2885_v16 }
 0x1ab   :  { %v2904_v22 = vpack.c.bf16 %v651_v19, %v647_v18  ;;  %v1294_v42 = vadd.bf16 1065369472, %v2139_v20  ;;  %v1106_v24 = vadd.bf16 %v1042_v43, %v2885_v16 }
 0x1ac   :  { %v915_v25 = vmul.bf16 1027030327, %v2901_v40  ;;  %v1169_v35 = vmul.bf16 1061961548, %v1105_v37  ;;  %v1357_v58 = vmul.bf16 %v1293_v30, %v845_v51 }
 0x1ad   :  { %v916_v41 = vmul.bf16 1027030327, %v2904_v22  ;;  %v654_v2 = vpop.f32.mrb[92].mxu0  ;;  %v1358_v28 = vmul.bf16 %v1294_v42, %v846_v21  ;;  %v1170_v32 = vmul.bf16 1061961548, %v1106_v24 }
 0x1ae   :  { %v656_v33 = vpop.f32.mrb[93].mxu0  ;;  %v979_v55 = vmul.bf16 %v915_v25, %v2901_v40  ;;  %v655_v39 = vadd.f32 %v654_v2, %v2486_v1  ;;  %v849_v42 = vmul.bf16 1056980736, %v2882_v48 }
 0x1af   :  { %v658_v36 = vpop.f32.mrb[94].mxu0  ;;  %1702 = vmatprep.mubr.bf16.mxu1 %v1358_v28  ;;  %2144 = vtanh.bf16 %v1170_v32  ;;  %v980_v14 = vmul.bf16 %v916_v41, %v2904_v22  ;;  %v657_v45 = vadd.f32 %v656_v33, %v2488_v4 }
 0x1b0   :  { %v659_v44 = vadd.f32 %v658_v36, %v2486_v1  ;;  %v660_v5 = vpop.f32.mrb[95].mxu0  ;;  %2146 = vtanh.bf16 %v1169_v35  ;;  %v1043_v63 = vmul.bf16 %v979_v55, %v2901_v40  ;;  %1703 = vmatmul.mubr.bf16.gmra.mrb[68].mxu1 %v1357_v58 }
 0x1b1   :  { %v661_v8 = vadd.f32 %v660_v5, %v2488_v4  ;;  %v1044_v46 = vmul.bf16 %v980_v14, %v2904_v22 }
 0x1b2   :  { %v2141_v13 = vpop.eup %2140  ;;  %v2919_v56 = vpack.c.bf16 %v659_v44, %v655_v39  ;;  %v1107_v3 = vadd.bf16 %v1043_v63, %v2901_v40 }
 0x1b3   :  { %v2143_v49 = vpop.eup %2142  ;;  %v2923_v50 = vpack.c.bf16 %v661_v8, %v657_v45  ;;  %v1296_v11 = vadd.bf16 1065369472, %v2141_v13  ;;  %v1108_v54 = vadd.bf16 %v1044_v46, %v2904_v22  ;;  %v852_v46 = vmul.bf16 1056980736, %v2904_v22 }
 0x1b4   :  { %v917_v12 = vmul.bf16 1027030327, %v2919_v56  ;;  %v1295_v15 = vadd.bf16 1065369472, %v2143_v49  ;;  %v1171_v57 = vmul.bf16 1061961548, %v1107_v3 }
 0x1b5   :  { %v918_v7 = vmul.bf16 1027030327, %v2923_v50  ;;  %v664_v59 = vpop.f32.mrb[96].mxu0  ;;  %v1360_v60 = vmul.bf16 %v1296_v11, %v848_v47  ;;  %v1172_v61 = vmul.bf16 1061961548, %v1108_v54 }
 0x1b6   :  { %v666_v52 = vpop.f32.mrb[97].mxu0  ;;  %2148 = vtanh.bf16 %v1171_v57  ;;  %v1359_v0 = vmul.bf16 %v1295_v15, %v847_v53  ;;  %v665_v27 = vadd.f32 %v664_v59, %v2486_v1  ;;  %v981_v9 = vmul.bf16 %v917_v12, %v2919_v56 }
 0x1b7   :  { %v668_v62 = vpop.f32.mrb[98].mxu0  ;;  %1710 = vmatprep.mubr.bf16.mxu1 %v1360_v60  ;;  %2150 = vtanh.bf16 %v1172_v61  ;;  %v982_v6 = vmul.bf16 %v918_v7, %v2923_v50  ;;  %v667_v26 = vadd.f32 %v666_v52, %v2488_v4  ;;  %v851_v54 = vmul.bf16 1056980736, %v2901_v40 }
 0x1b8   :  { %v669_v31 = vadd.f32 %v668_v62, %v2486_v1  ;;  %v670_v34 = vpop.f32.mrb[99].mxu0  ;;  %1711 = vmatmul.mubr.bf16.gmra.mrb[72].mxu1 %v1359_v0  ;;  %v1045_v18 = vmul.bf16 %v981_v9, %v2919_v56 }
 0x1b9   :  { %v671_v23 = vadd.f32 %v670_v34, %v2488_v4  ;;  %v1046_v10 = vmul.bf16 %v982_v6, %v2923_v50 }
 0x1ba   :  { %v2145_v29 = vpop.eup %2144  ;;  %v2936_v17 = vpack.c.bf16 %v669_v31, %v665_v27  ;;  %v1109_v37 = vadd.bf16 %v1045_v18, %v2919_v56 }
 0x1bb   :  { %v2147_v19 = vpop.eup %2146  ;;  %v2939_v43 = vpack.c.bf16 %v671_v23, %v667_v26  ;;  %v1298_v20 = vadd.bf16 1065369472, %v2145_v29  ;;  %v1110_v21 = vadd.bf16 %v1046_v10, %v2923_v50  ;;  %v854_v10 = vmul.bf16 1056980736, %v2923_v50 }
 0x1bc   :  { %v919_v30 = vmul.bf16 1027030327, %v2936_v17  ;;  %v1297_v24 = vadd.bf16 1065369472, %v2147_v19  ;;  %v1173_v32 = vmul.bf16 1061961548, %v1109_v37 }
 0x1bd   :  { %v920_v25 = vmul.bf16 1027030327, %v2939_v43  ;;  %v674_v51 = vpop.f32.mrb[100].mxu0  ;;  %v1362_v41 = vmul.bf16 %v1298_v20, %v850_v38  ;;  %v1174_v2 = vmul.bf16 1061961548, %v1110_v21 }
 0x1be   :  { %v676_v28 = vpop.f32.mrb[101].mxu0  ;;  %v1361_v16 = vmul.bf16 %v1297_v24, %v849_v42  ;;  %v983_v55 = vmul.bf16 %v919_v30, %v2936_v17  ;;  %v675_v48 = vadd.f32 %v674_v51, %v2486_v1  ;;  %v853_v20 = vmul.bf16 1056980736, %v2919_v56 }
 0x1bf   :  { %v678_v33 = vpop.f32.mrb[102].mxu0  ;;  %1718 = vmatprep.mubr.bf16.mxu1 %v1362_v41  ;;  %2152 = vtanh.bf16 %v1174_v2  ;;  %v984_v35 = vmul.bf16 %v920_v25, %v2939_v43  ;;  %v677_v39 = vadd.f32 %v676_v28, %v2488_v4 }
 0x1c0   :  { %v679_v36 = vadd.f32 %v678_v33, %v2486_v1  ;;  %v680_v58 = vpop.f32.mrb[103].mxu0  ;;  %2154 = vtanh.bf16 %v1173_v32  ;;  %1719 = vmatmul.mubr.bf16.gmra.mrb[76].mxu1 %v1361_v16  ;;  %v1047_v63 = vmul.bf16 %v983_v55, %v2936_v17 }
 0x1c1   :  { %v2149_v14 = vpop.eup %2148  ;;  %v681_v44 = vadd.f32 %v680_v58, %v2488_v4  ;;  %v1048_v5 = vmul.bf16 %v984_v35, %v2939_v43 }
 0x1c2   :  { %v2151_v45 = vpop.eup %2150  ;;  %v2955_v8 = vpack.c.bf16 %v679_v36, %v675_v48  ;;  %v1299_v13 = vadd.bf16 1065369472, %v2149_v14  ;;  %v1111_v11 = vadd.bf16 %v1047_v63, %v2936_v17  ;;  %v856_v63 = vmul.bf16 1056980736, %v2939_v43 }
 0x1c3   :  { %v2958_v47 = vpack.c.bf16 %v681_v44, %v677_v39  ;;  %v1300_v3 = vadd.bf16 1065369472, %v2151_v45  ;;  %v1112_v49 = vadd.bf16 %v1048_v5, %v2939_v43 }
 0x1c4   :  { %v921_v53 = vmul.bf16 1027030327, %v2955_v8  ;;  %v1175_v60 = vmul.bf16 1061961548, %v1111_v11  ;;  %v1363_v52 = vmul.bf16 %v1299_v13, %v851_v54 }
 0x1c5   :  { %v922_v12 = vmul.bf16 1027030327, %v2958_v47  ;;  %v684_v15 = vpop.f32.mrb[104].mxu0  ;;  %v1364_v57 = vmul.bf16 %v1300_v3, %v852_v46  ;;  %v1176_v7 = vmul.bf16 1061961548, %v1112_v49 }
 0x1c6   :  { %v686_v59 = vpop.f32.mrb[105].mxu0  ;;  %v985_v22 = vmul.bf16 %v921_v53, %v2955_v8  ;;  %v685_v0 = vadd.f32 %v684_v15, %v2486_v1  ;;  %v855_v3 = vmul.bf16 1056980736, %v2936_v17 }
 0x1c7   :  { %v688_v61 = vpop.f32.mrb[106].mxu0  ;;  %1726 = vmatprep.mubr.bf16.mxu1 %v1364_v57  ;;  %2156 = vtanh.bf16 %v1176_v7  ;;  %v986_v62 = vmul.bf16 %v922_v12, %v2958_v47  ;;  %v687_v31 = vadd.f32 %v686_v59, %v2488_v4 }
 0x1c8   :  { %v689_v6 = vadd.f32 %v688_v61, %v2486_v1  ;;  %v690_v40 = vpop.f32.mrb[107].mxu0  ;;  %2158 = vtanh.bf16 %v1175_v60  ;;  %v1049_v27 = vmul.bf16 %v985_v22, %v2955_v8  ;;  %1727 = vmatmul.mubr.bf16.gmra.mrb[80].mxu1 %v1363_v52 }
 0x1c9   :  { %v691_v34 = vadd.f32 %v690_v40, %v2488_v4  ;;  %v1050_v9 = vmul.bf16 %v986_v62, %v2958_v47 }
 0x1ca   :  { %v2153_v26 = vpop.eup %2152  ;;  %v2973_v23 = vpack.c.bf16 %v689_v6, %v685_v0  ;;  %v1113_v29 = vadd.bf16 %v1049_v27, %v2955_v8 }
 0x1cb   :  { %v2155_v18 = vpop.eup %2154  ;;  %v2977_v19 = vpack.c.bf16 %v691_v34, %v687_v31  ;;  %v1302_v38 = vadd.bf16 1065369472, %v2153_v26  ;;  %v1114_v21 = vadd.bf16 %v1050_v9, %v2958_v47  ;;  %v858_v9 = vmul.bf16 1056980736, %v2958_v47 }
 0x1cc   :  { %v923_v30 = vmul.bf16 1027030327, %v2973_v23  ;;  %v1301_v42 = vadd.bf16 1065369472, %v2155_v18  ;;  %v1177_v24 = vmul.bf16 1061961548, %v1113_v29 }
 0x1cd   :  { %v924_v37 = vmul.bf16 1027030327, %v2977_v19  ;;  %v694_v25 = vpop.f32.mrb[108].mxu0  ;;  %v1366_v51 = vmul.bf16 %v1302_v38, %v854_v10  ;;  %v1178_v41 = vmul.bf16 1061961548, %v1114_v21 }
 0x1ce   :  { %v696_v50 = vpop.f32.mrb[109].mxu0  ;;  %2160 = vtanh.bf16 %v1177_v24  ;;  %v1365_v28 = vmul.bf16 %v1301_v42, %v853_v20  ;;  %v695_v56 = vadd.f32 %v694_v25, %v2486_v1  ;;  %v987_v35 = vmul.bf16 %v923_v30, %v2973_v23 }
 0x1cf   :  { %v698_v2 = vpop.f32.mrb[110].mxu0  ;;  %1734 = vmatprep.mubr.bf16.mxu1 %v1366_v51  ;;  %2162 = vtanh.bf16 %v1178_v41  ;;  %v988_v32 = vmul.bf16 %v924_v37, %v2977_v19  ;;  %v697_v55 = vadd.f32 %v696_v50, %v2488_v4  ;;  %v857_v21 = vmul.bf16 1056980736, %v2955_v8 }
 0x1d0   :  { %v699_v33 = vadd.f32 %v698_v2, %v2486_v1  ;;  %v700_v16 = vpop.f32.mrb[111].mxu0  ;;  %1735 = vmatmul.mubr.bf16.gmra.mrb[84].mxu1 %v1365_v28  ;;  %v1051_v39 = vmul.bf16 %v987_v35, %v2973_v23 }
 0x1d1   :  { %v701_v48 = vadd.f32 %v700_v16, %v2488_v4  ;;  %v1052_v36 = vmul.bf16 %v988_v32, %v2977_v19 }
 0x1d2   :  { %v2157_v58 = vpop.eup %2156  ;;  %v2990_v14 = vpack.c.bf16 %v699_v33, %v695_v56  ;;  %v1115_v11 = vadd.bf16 %v1051_v39, %v2973_v23 }
 0x1d3   :  { %v2159_v44 = vpop.eup %2158  ;;  %v2993_v5 = vpack.c.bf16 %v701_v48, %v697_v55  ;;  %v1304_v45 = vadd.bf16 1065369472, %v2157_v58  ;;  %v1116_v46 = vadd.bf16 %v1052_v36, %v2977_v19  ;;  %v860_v36 = vmul.bf16 1056980736, %v2977_v19 }
 0x1d4   :  { %v925_v13 = vmul.bf16 1027030327, %v2990_v14  ;;  %v1303_v49 = vadd.bf16 1065369472, %v2159_v44  ;;  %v1179_v7 = vmul.bf16 1061961548, %v1115_v11 }
 0x1d5   :  { %v926_v53 = vmul.bf16 1027030327, %v2993_v5  ;;  %v704_v54 = vpop.f32.mrb[112].mxu0  ;;  %v1368_v12 = vmul.bf16 %v1304_v45, %v856_v63  ;;  %v1180_v15 = vmul.bf16 1061961548, %v1116_v46 }
 0x1d6   :  { %v706_v57 = vpop.f32.mrb[113].mxu0  ;;  %v1367_v43 = vmul.bf16 %v1303_v49, %v855_v3  ;;  %v989_v22 = vmul.bf16 %v925_v13, %v2990_v14  ;;  %v705_v17 = vadd.f32 %v704_v54, %v2486_v1  ;;  %v859_v45 = vmul.bf16 1056980736, %v2973_v23 }
 0x1d7   :  { %v708_v59 = vpop.f32.mrb[114].mxu0  ;;  %1742 = vmatprep.mubr.bf16.mxu1 %v1368_v12  ;;  %2164 = vtanh.bf16 %v1180_v15  ;;  %v990_v60 = vmul.bf16 %v926_v53, %v2993_v5  ;;  %v707_v0 = vadd.f32 %v706_v57, %v2488_v4 }
 0x1d8   :  { %v709_v61 = vadd.f32 %v708_v59, %v2486_v1  ;;  %v710_v52 = vpop.f32.mrb[115].mxu0  ;;  %2166 = vtanh.bf16 %v1179_v7  ;;  %1743 = vmatmul.mubr.bf16.gmra.mrb[88].mxu1 %v1367_v43  ;;  %v1053_v27 = vmul.bf16 %v989_v22, %v2990_v14 }
 0x1d9   :  { %v2161_v62 = vpop.eup %2160  ;;  %v711_v6 = vadd.f32 %v710_v52, %v2488_v4  ;;  %v1054_v40 = vmul.bf16 %v990_v60, %v2993_v5 }
 0x1da   :  { %v2163_v31 = vpop.eup %2162  ;;  %v3009_v34 = vpack.c.bf16 %v709_v61, %v705_v17  ;;  %v1305_v26 = vadd.bf16 1065369472, %v2161_v62  ;;  %v1117_v38 = vadd.bf16 %v1053_v27, %v2990_v14  ;;  %v862_v27 = vmul.bf16 1056980736, %v2993_v5 }
 0x1db   :  { %v3012_v10 = vpack.c.bf16 %v711_v6, %v707_v0  ;;  %v1306_v29 = vadd.bf16 1065369472, %v2163_v31  ;;  %v1118_v18 = vadd.bf16 %v1054_v40, %v2993_v5 }
 0x1dc   :  { %v927_v20 = vmul.bf16 1027030327, %v3009_v34  ;;  %v1181_v51 = vmul.bf16 1061961548, %v1117_v38  ;;  %v1369_v50 = vmul.bf16 %v1305_v26, %v857_v21 }
 0x1dd   :  { %v928_v30 = vmul.bf16 1027030327, %v3012_v10  ;;  %v714_v42 = vpop.f32.mrb[116].mxu0  ;;  %v1370_v24 = vmul.bf16 %v1306_v29, %v858_v9  ;;  %v1182_v37 = vmul.bf16 1061961548, %v1118_v18 }
 0x1de   :  { %v716_v25 = vpop.f32.mrb[117].mxu0  ;;  %v991_v47 = vmul.bf16 %v927_v20, %v3009_v34  ;;  %v715_v28 = vadd.f32 %v714_v42, %v2486_v1  ;;  %v861_v29 = vmul.bf16 1056980736, %v2990_v14 }
 0x1df   :  { %v718_v41 = vpop.f32.mrb[118].mxu0  ;;  %1750 = vmatprep.mubr.bf16.mxu1 %v1370_v24  ;;  %2168 = vtanh.bf16 %v1182_v37  ;;  %v992_v2 = vmul.bf16 %v928_v30, %v3012_v10  ;;  %v717_v33 = vadd.f32 %v716_v25, %v2488_v4 }
 0x1e0   :  { %v719_v32 = vadd.f32 %v718_v41, %v2486_v1  ;;  %v720_v8 = vpop.f32.mrb[119].mxu0  ;;  %2170 = vtanh.bf16 %v1181_v51  ;;  %v1055_v56 = vmul.bf16 %v991_v47, %v3009_v34  ;;  %1751 = vmatmul.mubr.bf16.gmra.mrb[92].mxu1 %v1369_v50 }
 0x1e1   :  { %v721_v16 = vadd.f32 %v720_v8, %v2488_v4  ;;  %v1056_v35 = vmul.bf16 %v992_v2, %v3012_v10 }
 0x1e2   :  { %v2165_v55 = vpop.eup %2164  ;;  %v3027_v48 = vpack.c.bf16 %v719_v32, %v715_v28  ;;  %v1119_v58 = vadd.bf16 %v1055_v56, %v3009_v34 }
 0x1e3   :  { %v2167_v39 = vpop.eup %2166  ;;  %v3031_v44 = vpack.c.bf16 %v721_v16, %v717_v33  ;;  %v1308_v63 = vadd.bf16 1065369472, %v2165_v55  ;;  %v1120_v46 = vadd.bf16 %v1056_v35, %v3012_v10  ;;  %v864_v35 = vmul.bf16 1056980736, %v3012_v10 }
 0x1e4   :  { %v929_v13 = vmul.bf16 1027030327, %v3027_v48  ;;  %v1307_v3 = vadd.bf16 1065369472, %v2167_v39  ;;  %v1183_v49 = vmul.bf16 1061961548, %v1119_v58 }
 0x1e5   :  { %v930_v11 = vmul.bf16 1027030327, %v3031_v44  ;;  %v724_v53 = vpop.f32.mrb[120].mxu0  ;;  %v1372_v54 = vmul.bf16 %v1308_v63, %v860_v36  ;;  %v1184_v12 = vmul.bf16 1061961548, %v1120_v46 }
 0x1e6   :  { %v726_v19 = vpop.f32.mrb[121].mxu0  ;;  %2172 = vtanh.bf16 %v1183_v49  ;;  %v1371_v57 = vmul.bf16 %v1307_v3, %v859_v45  ;;  %v725_v23 = vadd.f32 %v724_v53, %v2486_v1  ;;  %v993_v60 = vmul.bf16 %v929_v13, %v3027_v48 }
 0x1e7   :  { %v728_v15 = vpop.f32.mrb[122].mxu0  ;;  %1758 = vmatprep.mubr.bf16.mxu1 %v1372_v54  ;;  %2174 = vtanh.bf16 %v1184_v12  ;;  %v994_v7 = vmul.bf16 %v930_v11, %v3031_v44  ;;  %v727_v22 = vadd.f32 %v726_v19, %v2488_v4  ;;  %v863_v45 = vmul.bf16 1056980736, %v3009_v34 }
 0x1e8   :  { %v729_v59 = vadd.f32 %v728_v15, %v2486_v1  ;;  %v730_v43 = vpop.f32.mrb[123].mxu0  ;;  %1759 = vmatmul.mubr.bf16.gmra.mrb[96].mxu1 %v1371_v57  ;;  %v1057_v0 = vmul.bf16 %v993_v60, %v3027_v48 }
 0x1e9   :  { %v731_v17 = vadd.f32 %v730_v43, %v2488_v4  ;;  %v1058_v61 = vmul.bf16 %v994_v7, %v3031_v44 }
 0x1ea   :  { %v2169_v52 = vpop.eup %2168  ;;  %v3044_v62 = vpack.c.bf16 %v729_v59, %v725_v23  ;;  %v1121_v38 = vadd.bf16 %v1057_v0, %v3027_v48 }
 0x1eb   :  { %v2171_v6 = vpop.eup %2170  ;;  %v3047_v40 = vpack.c.bf16 %v731_v17, %v727_v22  ;;  %v1310_v31 = vadd.bf16 1065369472, %v2169_v52  ;;  %v1122_v9 = vadd.bf16 %v1058_v61, %v3031_v44  ;;  %v866_v22 = vmul.bf16 1056980736, %v3031_v44 }
 0x1ec   :  { %v931_v26 = vmul.bf16 1027030327, %v3044_v62  ;;  %v1309_v18 = vadd.bf16 1065369472, %v2171_v6  ;;  %v1185_v37 = vmul.bf16 1061961548, %v1121_v38 }
 0x1ed   :  { %v932_v20 = vmul.bf16 1027030327, %v3047_v40  ;;  %v734_v21 = vpop.f32.mrb[124].mxu0  ;;  %v1374_v30 = vmul.bf16 %v1310_v31, %v862_v27  ;;  %v1186_v42 = vmul.bf16 1061961548, %v1122_v9 }
 0x1ee   :  { %v736_v24 = vpop.f32.mrb[125].mxu0  ;;  %v1373_v5 = vmul.bf16 %v1309_v18, %v861_v29  ;;  %v995_v47 = vmul.bf16 %v931_v26, %v3044_v62  ;;  %v735_v14 = vadd.f32 %v734_v21, %v2486_v1  ;;  %v865_v29 = vmul.bf16 1056980736, %v3027_v48 }
 0x1ef   :  { %v738_v25 = vpop.f32.mrb[126].mxu0  ;;  %1766 = vmatprep.mubr.bf16.mxu1 %v1374_v30  ;;  %2176 = vtanh.bf16 %v1186_v42  ;;  %v996_v51 = vmul.bf16 %v932_v20, %v3047_v40  ;;  %v737_v28 = vadd.f32 %v736_v24, %v2488_v4 }
 0x1f0   :  { %v739_v41 = vadd.f32 %v738_v25, %v2486_v1  ;;  %v740_v50 = vpop.f32.mrb[127].mxu0  ;;  %2178 = vtanh.bf16 %v1185_v37  ;;  %1767 = vmatmul.mubr.bf16.gmra.mrb[100].mxu1 %v1373_v5  ;;  %v1059_v56 = vmul.bf16 %v995_v47, %v3044_v62  ;;  %v3071_v1 = vld [vmem:[%s3170_s4] ss:$0 sm:$0xff]  ;;  %s2213_s4 = smov [#allocation2]  }
 0x1f1   :  { %v2173_v2 = vpop.eup %2172  ;;  %v741_v32 = vadd.f32 %v740_v50, %v2488_v4  ;;  %v1060_v8 = vmul.bf16 %v996_v51, %v3047_v40  ;;  %v868_v51 = vmul.bf16 1056980736, %v3047_v40  ;;  %s1876_s17 = sshll.u32 %s2213_s4, 4  ;;  %s1877_s17 = int_to_ptr.vmem [resolvable:$true] %s1876_s17 }
 0x1f2   :  { %v2175_v33 = vpop.eup %2174  ;;  %v3063_v16 = vpack.c.bf16 %v739_v41, %v735_v14  ;;  %v1311_v55 = vadd.bf16 1065369472, %v2173_v2  ;;  %v1123_v39 = vadd.bf16 %v1059_v56, %v3044_v62  ;;  %s2188_s18 = scalar_lea.vmem %s1877_s17, 8192  ;;  %p2193_p1 = scmp.lt.s32.totalorder %s1877_s17, %s1877_s17 }
 0x1f3   :  { %v3066_v36 = vpack.c.bf16 %v741_v32, %v737_v28  ;;  %v1312_v58 = vadd.bf16 1065369472, %v2175_v33  ;;  %v1124_v4 = vadd.bf16 %v1060_v8, %v3047_v40  ;;  %v867_v32 = vmul.bf16 1056980736, %v3044_v62  ;;  %p2189_p0 = scmp.ne.s32.totalorder %s1877_s17, %s2188_s18  ;;  %p2194_p2 = scmp.lt.s32.totalorder %s2188_s18, %s2188_s18 }
 0x1f4   :  { %v933_v63 = vmul.bf16 1027030327, %v3063_v16  ;;  %v1187_v53 = vmul.bf16 1061961548, %v1123_v39  ;;  %v1375_v19 = vmul.bf16 %v1311_v55, %v863_v45 }
 0x1f5   :  { %v934_v46 = vmul.bf16 1027030327, %v3066_v36  ;;  %v1552_v10 = vpop.f32.mrb[128].mxu0  ;;  %v1376_v13 = vmul.bf16 %v1312_v58, %v864_v35  ;;  %v1188_v3 = vmul.bf16 1061961548, %v1124_v4  ;;  %p2195_p3 = por %p2194_p2, %p2193_p1 }
 0x1f6   :  { %v1553_v49 = vadd.f32 %v3071_v1, %v1552_v10  ;;  %v1554_v11 = vpop.f32.mrb[129].mxu0  ;;  %v997_v54 = vmul.bf16 %v933_v63, %v3063_v16  ;;  %v870_v58 = vmul.bf16 1056980736, %v3066_v36  ;;  %v869_v10 = vmul.bf16 1056980736, %v3063_v16 }
 0x1f7   :  { %v1555_v12 = vpop.f32.mrb[130].mxu0  ;;  %1774 = vmatprep.mubr.bf16.mxu1 %v1376_v13  ;;  %2180 = vtanh.bf16 %v1188_v3  ;;  %v998_v15 = vmul.bf16 %v934_v46, %v3066_v36  ;;  %p2196_p4 = pnand %p2195_p3, %p2189_p0 }
 0x1f8   :  { %1807 = vst [vmem:[#allocation2] sm:$0xff] %v1553_v49  ;;  %v1556_v34 = vadd.f32 %v3071_v1, %v1555_v12  ;;  %v1557_v57 = vpop.f32.mrb[131].mxu0  ;;  %2182 = vtanh.bf16 %v1187_v53  ;;  %v1061_v7 = vmul.bf16 %v997_v54, %v3063_v16  ;;  %1775 = vmatmul.mubr.bf16.gmra.mrb[104].mxu1 %v1375_v19 }
 0x1f9   :  { %v1062_v23 = vmul.bf16 %v998_v15, %v3066_v36 }
 0x1fa   :  { %v2177_v59 = vpop.eup %2176  ;;  %1808 = vst [vmem:[#allocation2 + $0x8] sm:$0xff] %v1556_v34  ;;  %v1125_v43 = vadd.bf16 %v1061_v7, %v3063_v16 }
 0x1fb   :  { %v2179_v60 = vpop.eup %2178  ;;  %v1314_v17 = vadd.bf16 1065369472, %v2177_v59  ;;  %v1126_v61 = vadd.bf16 %v1062_v23, %v3066_v36  ;;  %v1568_v52 = vpop.f32.mrb[0].mxu1 }
 0x1fc   :  { %v1313_v0 = vadd.bf16 1065369472, %v2179_v60  ;;  %v1189_v6 = vmul.bf16 1061961548, %v1125_v43  ;;  %v1569_v27 = vadd.f32 %v3071_v1, %v1568_v52  ;;  %v1570_v31 = vpop.f32.mrb[1].mxu1 }
 0x1fd   :  { %v1560_v9 = vpop.f32.mrb[132].mxu0  ;;  %v1378_v26 = vmul.bf16 %v1314_v17, %v866_v22  ;;  %v1190_v18 = vmul.bf16 1061961548, %v1126_v61  ;;  %v1571_v20 = vpop.f32.mrb[2].mxu1 }
 0x1fe   :  { %v1561_v38 = vadd.f32 %v3071_v1, %v1560_v9  ;;  %v1562_v21 = vpop.f32.mrb[133].mxu0  ;;  %2184 = vtanh.bf16 %v1189_v6  ;;  %1811 = vst [vmem:[#allocation2 + $0x20] sm:$0xff] %v1569_v27  ;;  %v1572_v44 = vadd.f32 %v3071_v1, %v1571_v20  ;;  %v1573_v30 = vpop.f32.mrb[3].mxu1  ;;  %v1377_v24 = vmul.bf16 %v1313_v0, %v865_v29 }
 0x1ff   :  { %v1563_v42 = vpop.f32.mrb[134].mxu0  ;;  %1782 = vmatprep.mubr.bf16.mxu1 %v1378_v26  ;;  %2186 = vtanh.bf16 %v1190_v18 }
 0x200   :  { %1809 = vst [vmem:[#allocation2 + $0x10] sm:$0xff] %v1561_v38  ;;  %v1564_v37 = vadd.f32 %v3071_v1, %v1563_v42  ;;  %v1565_v25 = vpop.f32.mrb[135].mxu0  ;;  %1812 = vst [vmem:[#allocation2 + $0x28] sm:$0xff] %v1572_v44  ;;  %1783 = vmatmul.mubr.bf16.gmra.mrb[108].mxu1 %v1377_v24 }
 0x202   :  { %v2181_v48 = vpop.eup %2180  ;;  %1810 = vst [vmem:[#allocation2 + $0x18] sm:$0xff] %v1564_v37 }
 0x203   :  { %v2183_v5 = vpop.eup %2182  ;;  %v1316_v47 = vadd.bf16 1065369472, %v2181_v48  ;;  %v1576_v14 = vpop.f32.mrb[4].mxu1 }
 0x204   :  { %v1315_v41 = vadd.bf16 1065369472, %v2183_v5  ;;  %v1577_v50 = vadd.f32 %v3071_v1, %v1576_v14  ;;  %v1578_v2 = vpop.f32.mrb[5].mxu1 }
 0x205   :  { %v1380_v28 = vmul.bf16 %v1316_v47, %v868_v51  ;;  %v1579_v8 = vpop.f32.mrb[6].mxu1 }
 0x206   :  { %1813 = vst [vmem:[#allocation2 + $0x30] sm:$0xff] %v1577_v50  ;;  %v1580_v56 = vadd.f32 %v3071_v1, %v1579_v8  ;;  %v1581_v33 = vpop.f32.mrb[7].mxu1  ;;  %v1379_v35 = vmul.bf16 %v1315_v41, %v867_v32 }
 0x207   :  { %1790 = vmatprep.mubr.bf16.mxu1 %v1380_v28 }
 0x208   :  { %1814 = vst [vmem:[#allocation2 + $0x38] sm:$0xff] %v1580_v56  ;;  %1791 = vmatmul.mubr.bf16.gmra.mrb[112].mxu1 %v1379_v35 }
 0x209   :  { %v2185_v55 = vpop.eup %2184 }
 0x20a   :  { %v2187_v40 = vpop.eup %2186  ;;  %v1317_v39 = vadd.bf16 1065369472, %v2185_v55 }
 0x20b   :  { %v1318_v4 = vadd.bf16 1065369472, %v2187_v40  ;;  %v1584_v63 = vpop.f32.mrb[8].mxu1 }
 0x20c   :  { %v1585_v45 = vadd.f32 %v3071_v1, %v1584_v63  ;;  %v1586_v46 = vpop.f32.mrb[9].mxu1  ;;  %v1381_v11 = vmul.bf16 %v1317_v39, %v869_v10 }
 0x20d   :  { %v1382_v62 = vmul.bf16 %v1318_v4, %v870_v58  ;;  %v1587_v13 = vpop.f32.mrb[10].mxu1 }
 0x20e   :  { %1815 = vst [vmem:[#allocation2 + $0x40] sm:$0xff] %v1585_v45  ;;  %v1588_v3 = vadd.f32 %v3071_v1, %v1587_v13  ;;  %v1589_v49 = vpop.f32.mrb[11].mxu1 }
 0x20f   :  { %1798 = vmatprep.mubr.bf16.mxu1 %v1382_v62 }
 0x210   :  { %1816 = vst [vmem:[#allocation2 + $0x48] sm:$0xff] %v1588_v3  ;;  %1799 = vmatmul.mubr.bf16.gmra.mrb[116].mxu1 %v1381_v11 }
 0x213   :  { %v1592_v53 = vpop.f32.mrb[12].mxu1 }
 0x214   :  { %v1593_v36 = vadd.f32 %v3071_v1, %v1592_v53  ;;  %v1594_v54 = vpop.f32.mrb[13].mxu1 }
 0x215   :  { %v1595_v12 = vpop.f32.mrb[14].mxu1 }
 0x216   :  { %1817 = vst [vmem:[#allocation2 + $0x50] sm:$0xff] %v1593_v36  ;;  %v1596_v19 = vadd.f32 %v3071_v1, %v1595_v12  ;;  %v1597_v15 = vpop.f32.mrb[15].mxu1 }
 0x218   :  { %1818 = vst [vmem:[#allocation2 + $0x58] sm:$0xff] %v1596_v19 }
 0x21b   :  { %v1600_v16 = vpop.f32.mrb[16].mxu1 }
 0x21c   :  { %v1601_v34 = vadd.f32 %v3071_v1, %v1600_v16  ;;  %v1602_v57 = vpop.f32.mrb[17].mxu1 }
 0x21d   :  { %v1603_v7 = vpop.f32.mrb[18].mxu1 }
 0x21e   :  { %1819 = vst [vmem:[#allocation2 + $0x60] sm:$0xff] %v1601_v34  ;;  %v1604_v23 = vadd.f32 %v3071_v1, %v1603_v7  ;;  %v1605_v59 = vpop.f32.mrb[19].mxu1 }
 0x220   :  { %1820 = vst [vmem:[#allocation2 + $0x68] sm:$0xff] %v1604_v23 }
 0x223   :  { %v1608_v43 = vpop.f32.mrb[20].mxu1 }
 0x224   :  { %v1609_v60 = vadd.f32 %v3071_v1, %v1608_v43  ;;  %v1610_v22 = vpop.f32.mrb[21].mxu1 }
 0x225   :  { %v1611_v17 = vpop.f32.mrb[22].mxu1 }
 0x226   :  { %1821 = vst [vmem:[#allocation2 + $0x70] sm:$0xff] %v1609_v60  ;;  %v1612_v61 = vadd.f32 %v3071_v1, %v1611_v17  ;;  %v1613_v52 = vpop.f32.mrb[23].mxu1 }
 0x228   :  { %1822 = vst [vmem:[#allocation2 + $0x78] sm:$0xff] %v1612_v61 }
 0x22b   :  { %v1616_v0 = vpop.f32.mrb[24].mxu1 }
 0x22c   :  { %v1617_v6 = vadd.f32 %v3071_v1, %v1616_v0  ;;  %v1618_v27 = vpop.f32.mrb[25].mxu1 }
 0x22d   :  { %v1619_v31 = vpop.f32.mrb[26].mxu1 }
 0x22e   :  { %1823 = vst [vmem:[#allocation2 + $0x80] sm:$0xff] %v1617_v6  ;;  %v1620_v9 = vadd.f32 %v3071_v1, %v1619_v31  ;;  %v1621_v26 = vpop.f32.mrb[27].mxu1 }
 0x230   :  { %1824 = vst [vmem:[#allocation2 + $0x88] sm:$0xff] %v1620_v9 }
 0x233   :  { %v1624_v29 = vpop.f32.mrb[28].mxu1 }
 0x234   :  { %v1625_v18 = vadd.f32 %v3071_v1, %v1624_v29  ;;  %v1626_v38 = vpop.f32.mrb[29].mxu1 }
 0x235   :  { %v1627_v20 = vpop.f32.mrb[30].mxu1 }
 0x236   :  { %1825 = vst [vmem:[#allocation2 + $0x90] sm:$0xff] %v1625_v18  ;;  %v1628_v21 = vadd.f32 %v3071_v1, %v1627_v20  ;;  %v1629_v44 = vpop.f32.mrb[31].mxu1 }
 0x238   :  { %1826 = vst [vmem:[#allocation2 + $0x98] sm:$0xff] %v1628_v21 }
 0x23b   :  { %v1632_v30 = vpop.f32.mrb[32].mxu1 }
 0x23c   :  { %v1633_v42 = vadd.f32 %v3071_v1, %v1632_v30  ;;  %v1634_v24 = vpop.f32.mrb[33].mxu1 }
 0x23d   :  { %v1635_v37 = vpop.f32.mrb[34].mxu1 }
 0x23e   :  { %1827 = vst [vmem:[#allocation2 + $0xa0] sm:$0xff] %v1633_v42  ;;  %v1636_v25 = vadd.f32 %v3071_v1, %v1635_v37  ;;  %v1637_v48 = vpop.f32.mrb[35].mxu1 }
 0x240   :  { %1828 = vst [vmem:[#allocation2 + $0xa8] sm:$0xff] %v1636_v25 }
 0x243   :  { %v1640_v5 = vpop.f32.mrb[36].mxu1 }
 0x244   :  { %v1641_v51 = vadd.f32 %v3071_v1, %v1640_v5  ;;  %v1642_v47 = vpop.f32.mrb[37].mxu1 }
 0x245   :  { %v1643_v14 = vpop.f32.mrb[38].mxu1 }
 0x246   :  { %1829 = vst [vmem:[#allocation2 + $0xb0] sm:$0xff] %v1641_v51  ;;  %v1644_v41 = vadd.f32 %v3071_v1, %v1643_v14  ;;  %v1645_v50 = vpop.f32.mrb[39].mxu1 }
 0x248   :  { %1830 = vst [vmem:[#allocation2 + $0xb8] sm:$0xff] %v1644_v41 }
 0x24b   :  { %v1648_v2 = vpop.f32.mrb[40].mxu1 }
 0x24c   :  { %v1649_v28 = vadd.f32 %v3071_v1, %v1648_v2  ;;  %v1650_v32 = vpop.f32.mrb[41].mxu1 }
 0x24d   :  { %v1651_v8 = vpop.f32.mrb[42].mxu1 }
 0x24e   :  { %1831 = vst [vmem:[#allocation2 + $0xc0] sm:$0xff] %v1649_v28  ;;  %v1652_v56 = vadd.f32 %v3071_v1, %v1651_v8  ;;  %v1653_v33 = vpop.f32.mrb[43].mxu1 }
 0x250   :  { %1832 = vst [vmem:[#allocation2 + $0xc8] sm:$0xff] %v1652_v56 }
 0x253   :  { %v1656_v35 = vpop.f32.mrb[44].mxu1 }
 0x254   :  { %v1657_v55 = vadd.f32 %v3071_v1, %v1656_v35  ;;  %v1658_v40 = vpop.f32.mrb[45].mxu1 }
 0x255   :  { %v1659_v58 = vpop.f32.mrb[46].mxu1 }
 0x256   :  { %1833 = vst [vmem:[#allocation2 + $0xd0] sm:$0xff] %v1657_v55  ;;  %v1660_v4 = vadd.f32 %v3071_v1, %v1659_v58  ;;  %v1661_v39 = vpop.f32.mrb[47].mxu1 }
 0x258   :  { %1834 = vst [vmem:[#allocation2 + $0xd8] sm:$0xff] %v1660_v4 }
 0x25b   :  { %v1664_v63 = vpop.f32.mrb[48].mxu1 }
 0x25c   :  { %v1665_v45 = vadd.f32 %v3071_v1, %v1664_v63  ;;  %v1666_v46 = vpop.f32.mrb[49].mxu1 }
 0x25d   :  { %v1667_v62 = vpop.f32.mrb[50].mxu1 }
 0x25e   :  { %1835 = vst [vmem:[#allocation2 + $0xe0] sm:$0xff] %v1665_v45  ;;  %v1668_v10 = vadd.f32 %v3071_v1, %v1667_v62  ;;  %v1669_v13 = vpop.f32.mrb[51].mxu1 }
 0x260   :  { %1836 = vst [vmem:[#allocation2 + $0xe8] sm:$0xff] %v1668_v10 }
 0x263   :  { %v1672_v3 = vpop.f32.mrb[52].mxu1 }
 0x264   :  { %v1673_v49 = vadd.f32 %v3071_v1, %v1672_v3  ;;  %v1674_v11 = vpop.f32.mrb[53].mxu1 }
 0x265   :  { %v1675_v53 = vpop.f32.mrb[54].mxu1 }
 0x266   :  { %1837 = vst [vmem:[#allocation2 + $0xf0] sm:$0xff] %v1673_v49  ;;  %v1676_v36 = vadd.f32 %v3071_v1, %v1675_v53  ;;  %v1677_v54 = vpop.f32.mrb[55].mxu1 }
 0x268   :  { %1838 = vst [vmem:[#allocation2 + $0xf8] sm:$0xff] %v1676_v36 }
 0x26b   :  { %v1680_v12 = vpop.f32.mrb[56].mxu1 }
 0x26c   :  { %v1681_v19 = vadd.f32 %v3071_v1, %v1680_v12  ;;  %v1682_v15 = vpop.f32.mrb[57].mxu1 }
 0x26d   :  { %v1683_v16 = vpop.f32.mrb[58].mxu1 }
 0x26e   :  { %1839 = vst [vmem:[#allocation2 + $0x100] sm:$0xff] %v1681_v19  ;;  %v1684_v34 = vadd.f32 %v3071_v1, %v1683_v16  ;;  %v1685_v57 = vpop.f32.mrb[59].mxu1 }
 0x270   :  { %1840 = vst [vmem:[#allocation2 + $0x108] sm:$0xff] %v1684_v34 }
 0x273   :  { %v1688_v7 = vpop.f32.mrb[60].mxu1 }
 0x274   :  { %v1689_v23 = vadd.f32 %v3071_v1, %v1688_v7  ;;  %v1690_v59 = vpop.f32.mrb[61].mxu1 }
 0x275   :  { %v1691_v43 = vpop.f32.mrb[62].mxu1 }
 0x276   :  { %1841 = vst [vmem:[#allocation2 + $0x110] sm:$0xff] %v1689_v23  ;;  %v1692_v60 = vadd.f32 %v3071_v1, %v1691_v43  ;;  %v1693_v22 = vpop.f32.mrb[63].mxu1 }
 0x278   :  { %1842 = vst [vmem:[#allocation2 + $0x118] sm:$0xff] %v1692_v60 }
 0x27b   :  { %v1696_v17 = vpop.f32.mrb[64].mxu1 }
 0x27c   :  { %v1697_v61 = vadd.f32 %v3071_v1, %v1696_v17  ;;  %v1698_v52 = vpop.f32.mrb[65].mxu1 }
 0x27d   :  { %v1699_v0 = vpop.f32.mrb[66].mxu1 }
 0x27e   :  { %1843 = vst [vmem:[#allocation2 + $0x120] sm:$0xff] %v1697_v61  ;;  %v1700_v6 = vadd.f32 %v3071_v1, %v1699_v0  ;;  %v1701_v27 = vpop.f32.mrb[67].mxu1 }
 0x280   :  { %1844 = vst [vmem:[#allocation2 + $0x128] sm:$0xff] %v1700_v6 }
 0x283   :  { %v1704_v31 = vpop.f32.mrb[68].mxu1 }
 0x284   :  { %v1705_v9 = vadd.f32 %v3071_v1, %v1704_v31  ;;  %v1706_v26 = vpop.f32.mrb[69].mxu1 }
 0x285   :  { %v1707_v29 = vpop.f32.mrb[70].mxu1 }
 0x286   :  { %1845 = vst [vmem:[#allocation2 + $0x130] sm:$0xff] %v1705_v9  ;;  %v1708_v18 = vadd.f32 %v3071_v1, %v1707_v29  ;;  %v1709_v38 = vpop.f32.mrb[71].mxu1 }
 0x288   :  { %1846 = vst [vmem:[#allocation2 + $0x138] sm:$0xff] %v1708_v18 }
 0x28b   :  { %v1712_v20 = vpop.f32.mrb[72].mxu1 }
 0x28c   :  { %v1713_v21 = vadd.f32 %v3071_v1, %v1712_v20  ;;  %v1714_v44 = vpop.f32.mrb[73].mxu1 }
 0x28d   :  { %v1715_v30 = vpop.f32.mrb[74].mxu1 }
 0x28e   :  { %1847 = vst [vmem:[#allocation2 + $0x140] sm:$0xff] %v1713_v21  ;;  %v1716_v42 = vadd.f32 %v3071_v1, %v1715_v30  ;;  %v1717_v24 = vpop.f32.mrb[75].mxu1 }
 0x290   :  { %1848 = vst [vmem:[#allocation2 + $0x148] sm:$0xff] %v1716_v42 }
 0x293   :  { %v1720_v37 = vpop.f32.mrb[76].mxu1 }
 0x294   :  { %v1721_v25 = vadd.f32 %v3071_v1, %v1720_v37  ;;  %v1722_v48 = vpop.f32.mrb[77].mxu1 }
 0x295   :  { %v1723_v5 = vpop.f32.mrb[78].mxu1 }
 0x296   :  { %1849 = vst [vmem:[#allocation2 + $0x150] sm:$0xff] %v1721_v25  ;;  %v1724_v51 = vadd.f32 %v3071_v1, %v1723_v5  ;;  %v1725_v47 = vpop.f32.mrb[79].mxu1 }
 0x298   :  { %1850 = vst [vmem:[#allocation2 + $0x158] sm:$0xff] %v1724_v51 }
 0x29b   :  { %v1728_v14 = vpop.f32.mrb[80].mxu1 }
 0x29c   :  { %v1729_v41 = vadd.f32 %v3071_v1, %v1728_v14  ;;  %v1730_v50 = vpop.f32.mrb[81].mxu1 }
 0x29d   :  { %v1731_v2 = vpop.f32.mrb[82].mxu1 }
 0x29e   :  { %1851 = vst [vmem:[#allocation2 + $0x160] sm:$0xff] %v1729_v41  ;;  %v1732_v28 = vadd.f32 %v3071_v1, %v1731_v2  ;;  %v1733_v32 = vpop.f32.mrb[83].mxu1 }
 0x2a0   :  { %1852 = vst [vmem:[#allocation2 + $0x168] sm:$0xff] %v1732_v28 }
 0x2a3   :  { %v1736_v8 = vpop.f32.mrb[84].mxu1 }
 0x2a4   :  { %v1737_v56 = vadd.f32 %v3071_v1, %v1736_v8  ;;  %v1738_v33 = vpop.f32.mrb[85].mxu1 }
 0x2a5   :  { %v1739_v35 = vpop.f32.mrb[86].mxu1 }
 0x2a6   :  { %1853 = vst [vmem:[#allocation2 + $0x170] sm:$0xff] %v1737_v56  ;;  %v1740_v55 = vadd.f32 %v3071_v1, %v1739_v35  ;;  %v1741_v40 = vpop.f32.mrb[87].mxu1 }
 0x2a8   :  { %1854 = vst [vmem:[#allocation2 + $0x178] sm:$0xff] %v1740_v55 }
 0x2ab   :  { %v1744_v58 = vpop.f32.mrb[88].mxu1 }
 0x2ac   :  { %v1745_v4 = vadd.f32 %v3071_v1, %v1744_v58  ;;  %v1746_v39 = vpop.f32.mrb[89].mxu1 }
 0x2ad   :  { %v1747_v63 = vpop.f32.mrb[90].mxu1 }
 0x2ae   :  { %1855 = vst [vmem:[#allocation2 + $0x180] sm:$0xff] %v1745_v4  ;;  %v1748_v45 = vadd.f32 %v3071_v1, %v1747_v63  ;;  %v1749_v46 = vpop.f32.mrb[91].mxu1 }
 0x2b0   :  { %1856 = vst [vmem:[#allocation2 + $0x188] sm:$0xff] %v1748_v45 }
 0x2b3   :  { %v1752_v62 = vpop.f32.mrb[92].mxu1 }
 0x2b4   :  { %v1753_v10 = vadd.f32 %v3071_v1, %v1752_v62  ;;  %v1754_v13 = vpop.f32.mrb[93].mxu1 }
 0x2b5   :  { %v1755_v3 = vpop.f32.mrb[94].mxu1 }
 0x2b6   :  { %1857 = vst [vmem:[#allocation2 + $0x190] sm:$0xff] %v1753_v10  ;;  %v1756_v49 = vadd.f32 %v3071_v1, %v1755_v3  ;;  %v1757_v11 = vpop.f32.mrb[95].mxu1 }
 0x2b8   :  { %1858 = vst [vmem:[#allocation2 + $0x198] sm:$0xff] %v1756_v49 }
 0x2bb   :  { %v1760_v53 = vpop.f32.mrb[96].mxu1 }
 0x2bc   :  { %v1761_v36 = vadd.f32 %v3071_v1, %v1760_v53  ;;  %v1762_v54 = vpop.f32.mrb[97].mxu1 }
 0x2bd   :  { %v1763_v12 = vpop.f32.mrb[98].mxu1 }
 0x2be   :  { %1859 = vst [vmem:[#allocation2 + $0x1a0] sm:$0xff] %v1761_v36  ;;  %v1764_v19 = vadd.f32 %v3071_v1, %v1763_v12  ;;  %v1765_v15 = vpop.f32.mrb[99].mxu1 }
 0x2c0   :  { %1860 = vst [vmem:[#allocation2 + $0x1a8] sm:$0xff] %v1764_v19 }
 0x2c3   :  { %v1768_v16 = vpop.f32.mrb[100].mxu1 }
 0x2c4   :  { %v1769_v34 = vadd.f32 %v3071_v1, %v1768_v16  ;;  %v1770_v57 = vpop.f32.mrb[101].mxu1 }
 0x2c5   :  { %v1771_v7 = vpop.f32.mrb[102].mxu1 }
 0x2c6   :  { %1861 = vst [vmem:[#allocation2 + $0x1b0] sm:$0xff] %v1769_v34  ;;  %v1772_v23 = vadd.f32 %v3071_v1, %v1771_v7  ;;  %v1773_v59 = vpop.f32.mrb[103].mxu1 }
 0x2c8   :  { %1862 = vst [vmem:[#allocation2 + $0x1b8] sm:$0xff] %v1772_v23 }
 0x2cb   :  { %v1776_v43 = vpop.f32.mrb[104].mxu1 }
 0x2cc   :  { %v1777_v60 = vadd.f32 %v3071_v1, %v1776_v43  ;;  %v1778_v22 = vpop.f32.mrb[105].mxu1 }
 0x2cd   :  { %v1779_v17 = vpop.f32.mrb[106].mxu1 }
 0x2ce   :  { %1863 = vst [vmem:[#allocation2 + $0x1c0] sm:$0xff] %v1777_v60  ;;  %v1780_v61 = vadd.f32 %v3071_v1, %v1779_v17  ;;  %v1781_v52 = vpop.f32.mrb[107].mxu1 }
 0x2d0   :  { %1864 = vst [vmem:[#allocation2 + $0x1c8] sm:$0xff] %v1780_v61 }
 0x2d3   :  { %v1784_v0 = vpop.f32.mrb[108].mxu1 }
 0x2d4   :  { %v1785_v6 = vadd.f32 %v3071_v1, %v1784_v0  ;;  %v1786_v27 = vpop.f32.mrb[109].mxu1 }
 0x2d5   :  { %v1787_v31 = vpop.f32.mrb[110].mxu1 }
 0x2d6   :  { %1865 = vst [vmem:[#allocation2 + $0x1d0] sm:$0xff] %v1785_v6  ;;  %v1788_v9 = vadd.f32 %v3071_v1, %v1787_v31  ;;  %v1789_v26 = vpop.f32.mrb[111].mxu1 }
 0x2d8   :  { %1866 = vst [vmem:[#allocation2 + $0x1d8] sm:$0xff] %v1788_v9 }
 0x2db   :  { %v1792_v29 = vpop.f32.mrb[112].mxu1 }
 0x2dc   :  { %v1793_v18 = vadd.f32 %v3071_v1, %v1792_v29  ;;  %v1794_v38 = vpop.f32.mrb[113].mxu1 }
 0x2dd   :  { %v1795_v20 = vpop.f32.mrb[114].mxu1 }
 0x2de   :  { %1867 = vst [vmem:[#allocation2 + $0x1e0] sm:$0xff] %v1793_v18  ;;  %v1796_v21 = vadd.f32 %v3071_v1, %v1795_v20  ;;  %v1797_v44 = vpop.f32.mrb[115].mxu1 }
 0x2e0   :  { %1868 = vst [vmem:[#allocation2 + $0x1e8] sm:$0xff] %v1796_v21 }
 0x2e3   :  { %v1800_v30 = vpop.f32.mrb[116].mxu1 }
 0x2e4   :  { %v1801_v42 = vadd.f32 %v3071_v1, %v1800_v30  ;;  %v1802_v24 = vpop.f32.mrb[117].mxu1 }
 0x2e5   :  { %v1803_v37 = vpop.f32.mrb[118].mxu1 }
 0x2e6   :  { %1869 = vst [vmem:[#allocation2 + $0x1f0] sm:$0xff] %v1801_v42  ;;  %v1804_v25 = vadd.f32 %v3071_v1, %v1803_v37  ;;  %v1805_v48 = vpop.f32.mrb[119].mxu1 }
 0x2e8   :  { %1870 = vst [vmem:[#allocation2 + $0x1f8] sm:$0xff] %v1804_v25 }
 0x2e9   :  { %2199 = shalt.err (!%p2196_p4)
}
 0x2ea   :  { %s2200_s21 = scalar_lea.hbm %s3171_s5, 8192 }
 0x2eb   :  { %p2201_p5 = scmp.ne.s32.totalorder %s3171_s5, %s2200_s21  ;;  %p2204_p6 = scmp.lt.u32.totalorder %s2200_s21, %s3171_s5 }
 0x2ed   :  { %p2206_p7 = pnand %p2204_p6, %p2201_p5 }
 0x2ef   :  { %2209 = shalt.err (!%p2206_p7)
}
 0x2f0   :  { %s2214_s26 = smov 128   ;;  %s2215_s27 = smov 8  }
 0x2f1   :  { %1882 = dma.vmem_to_hbm [thread:$0]  %s1877_s17, 8192, %s3171_s5, [#allocation3], %s2214_s26, %s2214_s26, %s2215_s27  }
 0x2f2   :  { %2210 = dma.done.wait [#allocation3], 8192  }
 0x2f3   :  { %2211 = vsyncadd [#allocation3], 4294959104 }
 0x2f4   :  { %1886 = vsyncpa [#allocation3], 1 }

</bundles_post_ra>
